<compile_context>
chip_gen: v6e
topology: v6e:2x2x1
jax: 0.10.0
libtpu: 0.0.40
codegen_flags: <defaults>
</compile_context>

<pallas_src>
import functools

import jax
import jax.numpy as jnp
from jax import lax
from jax.experimental import pallas as pl
from jax.experimental.pallas import tpu as pltpu


def _round_up(x, m):
    return ((x + m - 1) // m) * m


def _pad2(x, rows, cols):
    pr, pc = rows - x.shape[0], cols - x.shape[1]
    if pr == 0 and pc == 0:
        return x
    return jnp.pad(x, ((0, pr), (0, pc)))


def _vmem_capacity_bytes():
    try:
        cap = getattr(pltpu.get_tpu_info(), "vmem_capacity_bytes", None)
        if cap:
            return int(cap)
    except Exception:
        pass
    return 64 * 1024 * 1024          # conservative fallback (v7x per-TensorCore)


def _supinfonce_kernel(q_ref, k_ref, z_ref, qlab_ref, klab_ref, zlab_ref,   # inputs
                       out_ref,                                             # output
                       max_scr, neg_scr, cnt_scr, num_scr,                  # scratch
                       *, inv_temp, n_b, n_q, block_b, prec):
    f32 = jnp.float32
    neg_big = -1e30
    m_s = inv_temp                    # static shift: |cos| / temp <= 1/temp

    p = pl.program_id(0)              # 0: stats pass, 1: log-prob pass
    c = pl.program_id(1)              # queue tile (streamed)
    r = pl.program_id(2)              # row tile (innermost -> queue tile stays resident)
    n_c = pl.num_programs(1)

    b_pad = k_ref.shape[0]
    block_q = z_ref.shape[0]

    row0 = pl.multiple_of(r * block_b, block_b)
    rows = pl.ds(row0, block_b)

    # Pre-normalized query rows (1/temp already folded in) and their labels.
    qn = q_ref[rows, :]                                        # (block_b, d_pad)
    qlab = qlab_ref[rows, :]                                   # (block_b, 1) int32

    dims = (((1,), (1,)), ((), ()))

    # ---- queue-tile logits + masks (needed by both passes) ----
    l_n = lax.dot_general(qn, z_ref[...], dims, precision=prec,
                          preferred_element_type=f32)          # (block_b, block_q)
    qcol = c * block_q + lax.broadcasted_iota(jnp.int32, (1, block_q), 1)
    valid_n = qcol < n_q                                       # (1, block_q)
    pos_n = jnp.logical_and(qlab == zlab_ref[...], valid_n)    # (block_b, block_q)
    pos_n_f = pos_n.astype(f32)

    def keys_part():
        """Logits and masks for the keys (batch x batch) part (only at c == 0)."""
        l_p = lax.dot_general(qn, k_ref[...], dims, precision=prec,
                              preferred_element_type=f32)      # (block_b, b_pad)
        kcol = lax.broadcasted_iota(jnp.int32, (1, b_pad), 1)
        valid_k = kcol < n_b                                   # (1, b_pad)
        row_ids = row0 + lax.broadcasted_iota(jnp.int32, (block_b, 1), 0)
        mask_k = jnp.logical_and(valid_k, kcol != row_ids)     # inv_diag & valid
        pos_p = jnp.logical_and(qlab == klab_ref[...], mask_k)
        return l_p, valid_k, mask_k, pos_p

    # -------- pass 0: negatives' exp-sum, row max, positive count --------
    @pl.when(p == 0)
    def _stats():
        e_n = jnp.exp(l_n - m_s)                                 # <= 1, no rescale needed
        neg_n = jnp.sum(e_n * (valid_n.astype(f32) - pos_n_f), axis=1, keepdims=True)
        max_n = jnp.max(jnp.where(valid_n, l_n, neg_big), axis=1, keepdims=True)
        cnt_n = jnp.sum(pos_n_f, axis=1, keepdims=True)

        @pl.when(c == 0)
        def _init():
            l_p, valid_k, mask_k, pos_p = keys_part()
            pos_p_f = pos_p.astype(f32)
            e_p = jnp.exp(l_p - m_s)
            neg_p = jnp.sum(e_p * (mask_k.astype(f32) - pos_p_f), axis=1, keepdims=True)
            max_p = jnp.max(jnp.where(valid_k, l_p, neg_big), axis=1, keepdims=True)
            cnt_p = jnp.sum(pos_p_f, axis=1, keepdims=True)
            max_scr[rows, :] = jnp.maximum(max_n, max_p)
            neg_scr[rows, :] = neg_n + neg_p
            cnt_scr[rows, :] = cnt_n + cnt_p

        @pl.when(c != 0)
        def _acc():
            max_scr[rows, :] = jnp.maximum(max_scr[rows, :], max_n)
            neg_scr[rows, :] = neg_scr[rows, :] + neg_n
            cnt_scr[rows, :] = cnt_scr[rows, :] + cnt_n

    # -------- pass 1: sum over positives of log-probabilities --------
    @pl.when(p == 1)
    def _logprob():
        m_star = max_scr[rows, :]
        # Exact epsilon of the reference (which shifts by the true row max m*):
        #   (l - m*) - log(exp(l - m*) + neg(m*) + 1e-6)
        # = (l - m_s) - log(exp(l - m_s) + neg(m_s) + 1e-6 * exp(m* - m_s))
        denom = neg_scr[rows, :] + 1e-6 * jnp.exp(m_star - m_s)    # (block_b, 1)

        sh_n = l_n - m_s
        sum_n = jnp.sum(pos_n_f * (sh_n - jnp.log(jnp.exp(sh_n) + denom)),
                        axis=1, keepdims=True)

        @pl.when(c == 0)
        def _init():
            l_p, _, _, pos_p = keys_part()
            sh_p = l_p - m_s
            num_scr[rows, :] = jnp.sum(
                pos_p.astype(f32) * (sh_p - jnp.log(jnp.exp(sh_p) + denom)),
                axis=1, keepdims=True)

        num_scr[rows, :] = num_scr[rows, :] + sum_n

        @pl.when(c == n_c - 1)
        def _finalize():
            log_prob = num_scr[rows, :] / jnp.maximum(cnt_scr[rows, :], 1.0)
            rid = row0 + lax.broadcasted_iota(jnp.int32, (block_b, 1), 0)
            partial = jnp.sum(jnp.where(rid < n_b, log_prob, 0.0))
            out_ref[...] = jnp.broadcast_to(jnp.reshape(partial, (1, 1, 1)),
                                            out_ref.shape)


def sup_info_nce(query, keys, queue, query_labels, queue_labels, temp=0.05,
                 block_b=None, block_q=None, precision=None):
    """Forward of SupInfoNCE; returns the scalar loss."""
    B, D = query.shape
    Q, Dq = queue.shape
    assert keys.shape == (B, D) and Dq == D

    # MXU / HBM storage dtype: bf16 operands for bf16 inputs, f32 otherwise.
    storage_dtype = jnp.bfloat16 if query.dtype == jnp.bfloat16 else jnp.float32
    if precision is None:
        # f32 inputs: HIGHEST matches the f32 reference closely; pass
        # lax.Precision.HIGH (bf16_3x) for ~2x MXU throughput if tolerance allows.
        precision = (lax.Precision.HIGHEST if storage_dtype == jnp.float32
                     else lax.Precision.DEFAULT)
    itemsize = jnp.dtype(storage_dtype).itemsize
    sub = 16 if storage_dtype == jnp.bfloat16 else 8    # clean sublane packing

    # ---------------- tile sizes ----------------
    d_pad = _round_up(D, 128)
    mult_b = 256 if B >= 256 else sub                   # fill 2x256x256 MXU on real shapes
    if block_b is None:
        block_b = min(_round_up(B, mult_b), 512)
    block_b = max(sub, _round_up(block_b, sub))
    block_b = min(block_b, _round_up(B, sub))
    b_pad = _round_up(B, block_b)
    n_r = b_pad // block_b

    vmem_cap = _vmem_capacity_bytes()
    budget = int(vmem_cap * 0.75)
    # Resident (double-buffered) buffers that do not depend on block_q.
    fixed = (2 * 2 * b_pad * d_pad * itemsize          # query + keys (x2 buffers each)
             + 4 * b_pad * 512                         # four (b_pad, 1) f32 scratches
             + 2 * (b_pad * 512 + 32 * b_pad)          # label buffers
             + 8 * block_b * b_pad)                    # f32 keys-logits intermediates
    per_col = 2 * d_pad * itemsize + 64 + 8 * block_b  # queue tile (x2) + labels + logits
    mult_q = 256 if Q >= 256 else 128
    if block_q is None:
        avail = budget - fixed - (8 << 20)
        block_q = max(mult_q, min(avail // per_col, 4096))
        block_q = (block_q // mult_q) * mult_q
    block_q = max(128, _round_up(block_q, 128))
    block_q = min(block_q, _round_up(Q, 128))
    q_pad = _round_up(Q, block_q)
    n_c = q_pad // block_q

    vmem_limit = int(min(vmem_cap,
                         max(48 << 20, fixed + per_col * block_q + (8 << 20))))

    # ------------- wrapper-side preprocessing (one fused XLA pass) -------------
    def _prep(x, scale):
        xf = x.astype(jnp.float32)
        inv = lax.rsqrt(jnp.maximum(jnp.sum(xf * xf, axis=-1, keepdims=True), 1e-16))
        return (xf * (inv * scale)).astype(storage_dtype)

    qn = _pad2(_prep(query, 1.0 / float(temp)), b_pad, d_pad)    # 1/temp folded in
    kn = _pad2(_prep(keys, 1.0), b_pad, d_pad)
    zn = _pad2(_prep(queue, 1.0), q_pad, d_pad)

    ql32 = query_labels.astype(jnp.int32)
    qlab = _pad2(ql32.reshape(B, 1), b_pad, 1)                   # query labels, column
    klab = _pad2(ql32.reshape(1, B), 1, b_pad)                   # key labels (= query), row
    zlab = _pad2(queue_labels.astype(jnp.int32).reshape(1, Q), 1, q_pad)

    kernel = functools.partial(
        _supinfonce_kernel, inv_temp=1.0 / float(temp), n_b=B, n_q=Q,
        block_b=block_b, prec=precision)

    out = pl.pallas_call(
        kernel,
        out_shape=jax.ShapeDtypeStruct((n_r, 8, 128), jnp.float32),
        grid_spec=pltpu.PrefetchScalarGridSpec(
            num_scalar_prefetch=0,
            # (pass, queue tile, row tile): row tile innermost so each queue tile is
            # fetched from HBM only twice total (once per pass), not 2*n_r times.
            grid=(2, n_c, n_r),
            in_specs=[
                pl.BlockSpec((b_pad, d_pad), lambda p, c, r: (0, 0)),     # query (resident)
                pl.BlockSpec((b_pad, d_pad), lambda p, c, r: (0, 0)),     # keys (resident)
                pl.BlockSpec((block_q, d_pad), lambda p, c, r: (c, 0)),   # queue (streamed)
                pl.BlockSpec((b_pad, 1), lambda p, c, r: (0, 0)),         # query labels col
                pl.BlockSpec((1, b_pad), lambda p, c, r: (0, 0)),         # key labels row
                pl.BlockSpec((1, block_q), lambda p, c, r: (0, c)),       # queue labels row
            ],
            out_specs=pl.BlockSpec((1, 8, 128), lambda p, c, r: (r, 0, 0)),
            scratch_shapes=[pltpu.VMEM((b_pad, 1), jnp.float32)] * 4,
        ),
        compiler_params=pltpu.CompilerParams(
            dimension_semantics=("arbitrary", "arbitrary", "arbitrary"),
            vmem_limit_bytes=vmem_limit,
        ),
        cost_estimate=pl.CostEstimate(
            flops=4 * b_pad * d_pad * (b_pad + q_pad),
            transcendentals=3 * b_pad * (b_pad + q_pad),
            bytes_accessed=(2 * q_pad + 2 * b_pad) * d_pad * itemsize,
        ),
    )(qn, kn, zn, qlab, klab, zlab)

    # Tiny n_r-element epilogue in the wrapper (per-row-tile partial sums).
    return -jnp.sum(out[:, 0, 0]) / B


def _reference(query, keys, queue, query_labels, queue_labels, temp=0.05):
    """Pure-JAX transcription of the PyTorch forward (for verification)."""
    def cos(a, b):  # a: (B,1,D), b: (1,N,D)
        num = jnp.sum(a * b, axis=-1)
        na = jnp.linalg.norm(a, axis=-1)
        nb = jnp.linalg.norm(b, axis=-1)
        return num / (jnp.maximum(na, 1e-8) * jnp.maximum(nb, 1e-8))

    sim_pos = cos(query[:, None, :], keys[None, :, :])
    sim_neg = cos(query[:, None, :], queue[None, :, :])
    logits = jnp.concatenate([sim_pos, sim_neg], axis=1) / temp
    logits = logits - jnp.max(logits, axis=1, keepdims=True)
    B, Q = query.shape[0], queue.shape[0]
    inv_diag = jnp.concatenate(
        [~jnp.eye(B, dtype=bool), jnp.ones((B, Q), dtype=bool)], axis=1)
    target = jnp.concatenate([query_labels, queue_labels], axis=0)
    pos = (query_labels[:, None] == target[None, :]) & inv_diag
    posf = pos.astype(jnp.float32)
    invf = inv_diag.astype(jnp.float32)
    uni = jnp.exp(logits) * invf
    uni = uni * posf + jnp.sum(uni * (1.0 - posf) * invf, axis=1, keepdims=True)
    uni = jnp.log(uni + 1e-6)
    log_prob = logits - uni
    log_prob = (jnp.sum(posf * log_prob, axis=1, keepdims=True)
                / jnp.maximum(jnp.sum(posf, axis=1, keepdims=True), 1.0))
    return -jnp.mean(log_prob)


if __name__ == "__main__":
    rng = jax.random.PRNGKey(0)
    k1, k2, k3, k4, k5 = jax.random.split(rng, 5)
    # Small but deliberately unaligned shapes: exercises D/B/Q padding, a
    # (2 passes, 2 queue tiles, 2 row tiles) grid, per-row-tile scratch slicing,
    # and the streamed-queue accumulation.
    B, Q, D = 24, 200, 72
    num_classes = 4

    query = jax.random.normal(k1, (B, D), dtype=jnp.float32)
    keys = jax.random.normal(k2, (B, D), dtype=jnp.float32)
    queue = jax.random.normal(k3, (Q, D), dtype=jnp.float32)
    query_labels = jax.random.randint(k4, (B,), 0, num_classes, dtype=jnp.int32)
    queue_labels = jax.random.randint(k5, (Q,), 0, num_classes, dtype=jnp.int32)

    ref = _reference(query, keys, queue, query_labels, queue_labels, temp=0.05)

    # f32 path, forced multi-tile grid (exercises all accumulation paths).
    loss_tiled = sup_info_nce(query, keys, queue, query_labels, queue_labels,
                              temp=0.05, block_b=16, block_q=128)
    loss_tiled = jax.block_until_ready(loss_tiled)
    assert jnp.allclose(loss_tiled, ref, atol=5e-4, rtol=5e-4), (loss_tiled, ref)

    # f32 path, auto-tiled defaults (single row/queue tile for these shapes).
    loss_auto = sup_info_nce(query, keys, queue, query_labels, queue_labels, temp=0.05)
    loss_auto = jax.block_until_ready(loss_auto)
    assert jnp.allclose(loss_auto, ref, atol=5e-4, rtol=5e-4), (loss_auto, ref)

    # bf16 path: bf16 MXU operands with f32 accumulation (half the HBM bytes).
    # Tolerance is the bf16-operand logit roundoff (~(1/temp) * 2^-8).
    loss_bf16 = sup_info_nce(query.astype(jnp.bfloat16), keys.astype(jnp.bfloat16),
                             queue.astype(jnp.bfloat16), query_labels, queue_labels,
                             temp=0.05, block_b=16, block_q=128)
    loss_bf16 = jax.block_until_ready(loss_bf16)
    assert bool(jnp.isfinite(loss_bf16)), loss_bf16
    assert abs(float(loss_bf16) - float(ref)) < 0.5, (loss_bf16, ref)

    print("KERNEL_OK")
</pallas_src>

<mosaic_0001>
module attributes {stable_mosaic.version = 11 : i64} {
  func.func @_supinfonce_kernel(%arg0: i32, %arg1: i32, %arg2: i32, %arg3: memref<32x128xf32, #tpu.memory_space<vmem>>, %arg4: memref<32x128xf32, #tpu.memory_space<vmem>>, %arg5: memref<128x128xf32, #tpu.memory_space<vmem>>, %arg6: memref<32x1xi32, #tpu.memory_space<vmem>>, %arg7: memref<1x32xi32, #tpu.memory_space<vmem>>, %arg8: memref<1x128xi32, #tpu.memory_space<vmem>>, %arg9: memref<1x8x128xf32, #tpu.memory_space<vmem>>, %arg10: memref<32x1xf32, #tpu.memory_space<vmem>>, %arg11: memref<32x1xf32, #tpu.memory_space<vmem>>, %arg12: memref<32x1xf32, #tpu.memory_space<vmem>>, %arg13: memref<32x1xf32, #tpu.memory_space<vmem>>) attributes {dimension_semantics = [#tpu.dimension_semantics<arbitrary>, #tpu.dimension_semantics<arbitrary>, #tpu.dimension_semantics<arbitrary>], iteration_bounds = array<i64: 2, 2, 2>, scalar_prefetch = 0 : i64, scratch_operands = 4 : i64, tpu.core_type = #tpu.core_type<tc>, window_params = [{pipeline_mode = #tpu.pipeline_mode<synchronous>, transform_indices = @transform_0, window_bounds = array<i64: 32, 128>}, {pipeline_mode = #tpu.pipeline_mode<synchronous>, transform_indices = @transform_1, window_bounds = array<i64: 32, 128>}, {transform_indices = @transform_2, window_bounds = array<i64: 128, 128>}, {pipeline_mode = #tpu.pipeline_mode<synchronous>, transform_indices = @transform_3, window_bounds = array<i64: 32, 1>}, {pipeline_mode = #tpu.pipeline_mode<synchronous>, transform_indices = @transform_4, window_bounds = array<i64: 1, 32>}, {transform_indices = @transform_5, window_bounds = array<i64: 1, 128>}, {transform_indices = @transform_6, window_bounds = array<i64: 1, 8, 128>}]} {
    %c16_i32 = arith.constant 16 : i32
    %0 = arith.muli %arg2, %c16_i32 : i32
    %1 = tpu.assume_multiple %0, 16 : i32
    %2 = arith.index_cast %1 : i32 to index
    %c0 = arith.constant 0 : index
    %3 = vector.load %arg3[%2, %c0] : memref<32x128xf32, #tpu.memory_space<vmem>>, vector<16x128xf32>
    %4 = arith.index_cast %1 : i32 to index
    %c0_0 = arith.constant 0 : index
    %5 = vector.load %arg6[%4, %c0_0] : memref<32x1xi32, #tpu.memory_space<vmem>>, vector<16x1xi32>
    %c0_1 = arith.constant 0 : index
    %c0_2 = arith.constant 0 : index
    %6 = vector.load %arg5[%c0_1, %c0_2] : memref<128x128xf32, #tpu.memory_space<vmem>>, vector<128x128xf32>
    %cst = arith.constant dense<0.000000e+00> : vector<16x128xf32>
    %7 = tpu.matmul %3, %6, %cst {dimension_numbers = #tpu.dot_dimension_numbers<[1], [1], [0], [0], [0, 0, 1, 0], [], []>, precision = #tpu.contract_precision<fp32>} : vector<16x128xf32>, vector<128x128xf32>, vector<16x128xf32> -> vector<16x128xf32>
    %c128_i32 = arith.constant 128 : i32
    %8 = arith.muli %arg1, %c128_i32 : i32
    %9 = tpu.iota {dimensions = array<i32: 1>} : vector<1x128xi32>
    %10 = vector.broadcast %8 : i32 to vector<1x128xi32>
    %11 = arith.addi %10, %9 : vector<1x128xi32>
    %c200_i32 = arith.constant 200 : i32
    %12 = vector.broadcast %c200_i32 : i32 to vector<1x128xi32>
    %13 = arith.cmpi slt, %11, %12 : vector<1x128xi32>
    %c0_3 = arith.constant 0 : index
    %c0_4 = arith.constant 0 : index
    %14 = vector.load %arg8[%c0_3, %c0_4] : memref<1x128xi32, #tpu.memory_space<vmem>>, vector<1x128xi32>
    %15 = vector.broadcast %5 : vector<16x1xi32> to vector<16x128xi32>
    %16 = vector.broadcast %14 : vector<1x128xi32> to vector<16x128xi32>
    %17 = arith.cmpi eq, %15, %16 : vector<16x128xi32>
    %18 = vector.broadcast %13 : vector<1x128xi1> to vector<16x128xi1>
    %19 = arith.andi %17, %18 : vector<16x128xi1>
    %20 = arith.extui %19 : vector<16x128xi1> to vector<16x128xi32>
    %21 = arith.sitofp %20 : vector<16x128xi32> to vector<16x128xf32>
    %c0_i32 = arith.constant 0 : i32
    %22 = arith.cmpi eq, %arg0, %c0_i32 : i32
    %23 = arith.extui %22 : i1 to i32
    %c0_i32_5 = arith.constant 0 : i32
    %24 = arith.cmpi ne, %23, %c0_i32_5 : i32
    scf.if %24 {
      %cst_7 = arith.constant 2.000000e+01 : f32
      %28 = vector.broadcast %cst_7 : f32 to vector<16x128xf32>
      %29 = arith.subf %7, %28 : vector<16x128xf32>
      %30 = math.exp %29 : vector<16x128xf32>
      %31 = arith.extui %13 : vector<1x128xi1> to vector<1x128xi32>
      %32 = arith.sitofp %31 : vector<1x128xi32> to vector<1x128xf32>
      %33 = vector.broadcast %32 : vector<1x128xf32> to vector<16x128xf32>
      %34 = arith.subf %33, %21 : vector<16x128xf32>
      %35 = arith.mulf %30, %34 : vector<16x128xf32>
      %cst_8 = arith.constant dense<0.000000e+00> : vector<16xf32>
      %36 = vector.multi_reduction <add>, %35, %cst_8 [1] : vector<16x128xf32> to vector<16xf32>
      %37 = vector.shape_cast %36 : vector<16xf32> to vector<16x1xf32>
      %cst_9 = arith.constant -1.000000e+30 : f32
      %38 = vector.shape_cast %13 : vector<1x128xi1> to vector<1x128xi1>
      %39 = vector.broadcast %38 : vector<1x128xi1> to vector<16x128xi1>
      %40 = vector.broadcast %cst_9 : f32 to vector<16x128xf32>
      %41 = arith.select %39, %7, %40 : vector<16x128xi1>, vector<16x128xf32>
      %cst_10 = arith.constant dense<0xFF800000> : vector<16xf32>
      %42 = vector.multi_reduction <maximumf>, %41, %cst_10 [1] : vector<16x128xf32> to vector<16xf32>
      %43 = vector.shape_cast %42 : vector<16xf32> to vector<16x1xf32>
      %cst_11 = arith.constant dense<0.000000e+00> : vector<16xf32>
      %44 = vector.multi_reduction <add>, %21, %cst_11 [1] : vector<16x128xf32> to vector<16xf32>
      %45 = vector.shape_cast %44 : vector<16xf32> to vector<16x1xf32>
      %c0_i32_12 = arith.constant 0 : i32
      %46 = arith.cmpi eq, %arg1, %c0_i32_12 : i32
      %47 = arith.extui %46 : i1 to i32
      %c0_i32_13 = arith.constant 0 : i32
      %48 = arith.cmpi ne, %47, %c0_i32_13 : i32
      scf.if %48 {
        %c0_16 = arith.constant 0 : index
        %c0_17 = arith.constant 0 : index
        %52 = vector.load %arg4[%c0_16, %c0_17] : memref<32x128xf32, #tpu.memory_space<vmem>>, vector<32x128xf32>
        %cst_18 = arith.constant dense<0.000000e+00> : vector<16x32xf32>
        %53 = tpu.matmul %3, %52, %cst_18 {dimension_numbers = #tpu.dot_dimension_numbers<[1], [1], [0], [0], [0, 0, 1, 0], [], []>, precision = #tpu.contract_precision<fp32>} : vector<16x128xf32>, vector<32x128xf32>, vector<16x32xf32> -> vector<16x32xf32>
        %54 = tpu.iota {dimensions = array<i32: 1>} : vector<1x32xi32>
        %c24_i32 = arith.constant 24 : i32
        %55 = vector.broadcast %c24_i32 : i32 to vector<1x32xi32>
        %56 = arith.cmpi slt, %54, %55 : vector<1x32xi32>
        %57 = tpu.iota {dimensions = array<i32: 0>} : vector<16x1xi32>
        %58 = vector.broadcast %1 : i32 to vector<16x1xi32>
        %59 = arith.addi %58, %57 : vector<16x1xi32>
        %60 = vector.broadcast %54 : vector<1x32xi32> to vector<16x32xi32>
        %61 = vector.broadcast %59 : vector<16x1xi32> to vector<16x32xi32>
        %62 = arith.cmpi ne, %60, %61 : vector<16x32xi32>
        %63 = vector.broadcast %56 : vector<1x32xi1> to vector<16x32xi1>
        %64 = arith.andi %63, %62 : vector<16x32xi1>
        %c0_19 = arith.constant 0 : index
        %c0_20 = arith.constant 0 : index
        %65 = vector.load %arg7[%c0_19, %c0_20] : memref<1x32xi32, #tpu.memory_space<vmem>>, vector<1x32xi32>
        %66 = vector.broadcast %5 : vector<16x1xi32> to vector<16x32xi32>
        %67 = vector.broadcast %65 : vector<1x32xi32> to vector<16x32xi32>
        %68 = arith.cmpi eq, %66, %67 : vector<16x32xi32>
        %69 = arith.andi %68, %64 : vector<16x32xi1>
        %70 = arith.extui %69 : vector<16x32xi1> to vector<16x32xi32>
        %71 = arith.sitofp %70 : vector<16x32xi32> to vector<16x32xf32>
        %cst_21 = arith.constant 2.000000e+01 : f32
        %72 = vector.broadcast %cst_21 : f32 to vector<16x32xf32>
        %73 = arith.subf %53, %72 : vector<16x32xf32>
        %74 = math.exp %73 : vector<16x32xf32>
        %75 = arith.extui %64 : vector<16x32xi1> to vector<16x32xi32>
        %76 = arith.sitofp %75 : vector<16x32xi32> to vector<16x32xf32>
        %77 = arith.subf %76, %71 : vector<16x32xf32>
        %78 = arith.mulf %74, %77 : vector<16x32xf32>
        %cst_22 = arith.constant dense<0.000000e+00> : vector<16xf32>
        %79 = vector.multi_reduction <add>, %78, %cst_22 [1] : vector<16x32xf32> to vector<16xf32>
        %80 = vector.shape_cast %79 : vector<16xf32> to vector<16x1xf32>
        %cst_23 = arith.constant -1.000000e+30 : f32
        %81 = vector.shape_cast %56 : vector<1x32xi1> to vector<1x32xi1>
        %82 = vector.broadcast %81 : vector<1x32xi1> to vector<16x32xi1>
        %83 = vector.broadcast %cst_23 : f32 to vector<16x32xf32>
        %84 = arith.select %82, %53, %83 : vector<16x32xi1>, vector<16x32xf32>
        %cst_24 = arith.constant dense<0xFF800000> : vector<16xf32>
        %85 = vector.multi_reduction <maximumf>, %84, %cst_24 [1] : vector<16x32xf32> to vector<16xf32>
        %86 = vector.shape_cast %85 : vector<16xf32> to vector<16x1xf32>
        %cst_25 = arith.constant dense<0.000000e+00> : vector<16xf32>
        %87 = vector.multi_reduction <add>, %71, %cst_25 [1] : vector<16x32xf32> to vector<16xf32>
        %88 = vector.shape_cast %87 : vector<16xf32> to vector<16x1xf32>
        %89 = arith.maximumf %43, %86 : vector<16x1xf32>
        %90 = arith.index_cast %1 : i32 to index
        %c0_26 = arith.constant 0 : index
        %91 = vector.load %arg10[%90, %c0_26] : memref<32x1xf32, #tpu.memory_space<vmem>>, vector<16x1xf32>
        tpu.vector_store %arg10[%90, %c0_26], %89 {strides = array<i32>} : memref<32x1xf32, #tpu.memory_space<vmem>>, vector<16x1xf32>,
        %92 = arith.addf %37, %80 : vector<16x1xf32>
        %93 = arith.index_cast %1 : i32 to index
        %c0_27 = arith.constant 0 : index
        %94 = vector.load %arg11[%93, %c0_27] : memref<32x1xf32, #tpu.memory_space<vmem>>, vector<16x1xf32>
        tpu.vector_store %arg11[%93, %c0_27], %92 {strides = array<i32>} : memref<32x1xf32, #tpu.memory_space<vmem>>, vector<16x1xf32>,
        %95 = arith.addf %45, %88 : vector<16x1xf32>
        %96 = arith.index_cast %1 : i32 to index
        %c0_28 = arith.constant 0 : index
        %97 = vector.load %arg12[%96, %c0_28] : memref<32x1xf32, #tpu.memory_space<vmem>>, vector<16x1xf32>
        tpu.vector_store %arg12[%96, %c0_28], %95 {strides = array<i32>} : memref<32x1xf32, #tpu.memory_space<vmem>>, vector<16x1xf32>,
      } else {
      }
      %c0_i32_14 = arith.constant 0 : i32
      %49 = arith.cmpi ne, %arg1, %c0_i32_14 : i32
      %50 = arith.extui %49 : i1 to i32
      %c0_i32_15 = arith.constant 0 : i32
      %51 = arith.cmpi ne, %50, %c0_i32_15 : i32
      scf.if %51 {
        %52 = arith.index_cast %1 : i32 to index
        %c0_16 = arith.constant 0 : index
        %53 = vector.load %arg10[%52, %c0_16] : memref<32x1xf32, #tpu.memory_space<vmem>>, vector<16x1xf32>
        %54 = arith.maximumf %53, %43 : vector<16x1xf32>
        %55 = arith.index_cast %1 : i32 to index
        %c0_17 = arith.constant 0 : index
        %56 = vector.load %arg10[%55, %c0_17] : memref<32x1xf32, #tpu.memory_space<vmem>>, vector<16x1xf32>
        tpu.vector_store %arg10[%55, %c0_17], %54 {strides = array<i32>} : memref<32x1xf32, #tpu.memory_space<vmem>>, vector<16x1xf32>,
        %57 = arith.index_cast %1 : i32 to index
        %c0_18 = arith.constant 0 : index
        %58 = vector.load %arg11[%57, %c0_18] : memref<32x1xf32, #tpu.memory_space<vmem>>, vector<16x1xf32>
        %59 = arith.addf %58, %37 : vector<16x1xf32>
        %60 = arith.index_cast %1 : i32 to index
        %c0_19 = arith.constant 0 : index
        %61 = vector.load %arg11[%60, %c0_19] : memref<32x1xf32, #tpu.memory_space<vmem>>, vector<16x1xf32>
        tpu.vector_store %arg11[%60, %c0_19], %59 {strides = array<i32>} : memref<32x1xf32, #tpu.memory_space<vmem>>, vector<16x1xf32>,
        %62 = arith.index_cast %1 : i32 to index
        %c0_20 = arith.constant 0 : index
        %63 = vector.load %arg12[%62, %c0_20] : memref<32x1xf32, #tpu.memory_space<vmem>>, vector<16x1xf32>
        %64 = arith.addf %63, %45 : vector<16x1xf32>
        %65 = arith.index_cast %1 : i32 to index
        %c0_21 = arith.constant 0 : index
        %66 = vector.load %arg12[%65, %c0_21] : memref<32x1xf32, #tpu.memory_space<vmem>>, vector<16x1xf32>
        tpu.vector_store %arg12[%65, %c0_21], %64 {strides = array<i32>} : memref<32x1xf32, #tpu.memory_space<vmem>>, vector<16x1xf32>,
      } else {
      }
    } else {
    }
    %c1_i32 = arith.constant 1 : i32
    %25 = arith.cmpi eq, %arg0, %c1_i32 : i32
    %26 = arith.extui %25 : i1 to i32
    %c0_i32_6 = arith.constant 0 : i32
    %27 = arith.cmpi ne, %26, %c0_i32_6 : i32
    scf.if %27 {
      %28 = arith.index_cast %1 : i32 to index
      %c0_7 = arith.constant 0 : index
      %29 = vector.load %arg10[%28, %c0_7] : memref<32x1xf32, #tpu.memory_space<vmem>>, vector<16x1xf32>
      %30 = arith.index_cast %1 : i32 to index
      %c0_8 = arith.constant 0 : index
      %31 = vector.load %arg11[%30, %c0_8] : memref<32x1xf32, #tpu.memory_space<vmem>>, vector<16x1xf32>
      %cst_9 = arith.constant 2.000000e+01 : f32
      %32 = vector.broadcast %cst_9 : f32 to vector<16x1xf32>
      %33 = arith.subf %29, %32 : vector<16x1xf32>
      %34 = math.exp %33 : vector<16x1xf32>
      %cst_10 = arith.constant 9.99999997E-7 : f32
      %35 = vector.broadcast %cst_10 : f32 to vector<16x1xf32>
      %36 = arith.mulf %35, %34 : vector<16x1xf32>
      %37 = arith.addf %31, %36 : vector<16x1xf32>
      %cst_11 = arith.constant 2.000000e+01 : f32
      %38 = vector.broadcast %cst_11 : f32 to vector<16x128xf32>
      %39 = arith.subf %7, %38 : vector<16x128xf32>
      %40 = math.exp %39 : vector<16x128xf32>
      %41 = vector.broadcast %37 : vector<16x1xf32> to vector<16x128xf32>
      %42 = arith.addf %40, %41 : vector<16x128xf32>
      %43 = math.log %42 : vector<16x128xf32>
      %44 = arith.subf %39, %43 : vector<16x128xf32>
      %45 = arith.mulf %21, %44 : vector<16x128xf32>
      %cst_12 = arith.constant dense<0.000000e+00> : vector<16xf32>
      %46 = vector.multi_reduction <add>, %45, %cst_12 [1] : vector<16x128xf32> to vector<16xf32>
      %47 = vector.shape_cast %46 : vector<16xf32> to vector<16x1xf32>
      %c0_i32_13 = arith.constant 0 : i32
      %48 = arith.cmpi eq, %arg1, %c0_i32_13 : i32
      %49 = arith.extui %48 : i1 to i32
      %c0_i32_14 = arith.constant 0 : i32
      %50 = arith.cmpi ne, %49, %c0_i32_14 : i32
      scf.if %50 {
        %c0_19 = arith.constant 0 : index
        %c0_20 = arith.constant 0 : index
        %59 = vector.load %arg4[%c0_19, %c0_20] : memref<32x128xf32, #tpu.memory_space<vmem>>, vector<32x128xf32>
        %cst_21 = arith.constant dense<0.000000e+00> : vector<16x32xf32>
        %60 = tpu.matmul %3, %59, %cst_21 {dimension_numbers = #tpu.dot_dimension_numbers<[1], [1], [0], [0], [0, 0, 1, 0], [], []>, precision = #tpu.contract_precision<fp32>} : vector<16x128xf32>, vector<32x128xf32>, vector<16x32xf32> -> vector<16x32xf32>
        %61 = tpu.iota {dimensions = array<i32: 1>} : vector<1x32xi32>
        %c24_i32 = arith.constant 24 : i32
        %62 = vector.broadcast %c24_i32 : i32 to vector<1x32xi32>
        %63 = arith.cmpi slt, %61, %62 : vector<1x32xi32>
        %64 = tpu.iota {dimensions = array<i32: 0>} : vector<16x1xi32>
        %65 = vector.broadcast %1 : i32 to vector<16x1xi32>
        %66 = arith.addi %65, %64 : vector<16x1xi32>
        %67 = vector.broadcast %61 : vector<1x32xi32> to vector<16x32xi32>
        %68 = vector.broadcast %66 : vector<16x1xi32> to vector<16x32xi32>
        %69 = arith.cmpi ne, %67, %68 : vector<16x32xi32>
        %70 = vector.broadcast %63 : vector<1x32xi1> to vector<16x32xi1>
        %71 = arith.andi %70, %69 : vector<16x32xi1>
        %c0_22 = arith.constant 0 : index
        %c0_23 = arith.constant 0 : index
        %72 = vector.load %arg7[%c0_22, %c0_23] : memref<1x32xi32, #tpu.memory_space<vmem>>, vector<1x32xi32>
        %73 = vector.broadcast %5 : vector<16x1xi32> to vector<16x32xi32>
        %74 = vector.broadcast %72 : vector<1x32xi32> to vector<16x32xi32>
        %75 = arith.cmpi eq, %73, %74 : vector<16x32xi32>
        %76 = arith.andi %75, %71 : vector<16x32xi1>
        %cst_24 = arith.constant 2.000000e+01 : f32
        %77 = vector.broadcast %cst_24 : f32 to vector<16x32xf32>
        %78 = arith.subf %60, %77 : vector<16x32xf32>
        %79 = arith.extui %76 : vector<16x32xi1> to vector<16x32xi32>
        %80 = arith.sitofp %79 : vector<16x32xi32> to vector<16x32xf32>
        %81 = math.exp %78 : vector<16x32xf32>
        %82 = vector.broadcast %37 : vector<16x1xf32> to vector<16x32xf32>
        %83 = arith.addf %81, %82 : vector<16x32xf32>
        %84 = math.log %83 : vector<16x32xf32>
        %85 = arith.subf %78, %84 : vector<16x32xf32>
        %86 = arith.mulf %80, %85 : vector<16x32xf32>
        %cst_25 = arith.constant dense<0.000000e+00> : vector<16xf32>
        %87 = vector.multi_reduction <add>, %86, %cst_25 [1] : vector<16x32xf32> to vector<16xf32>
        %88 = vector.shape_cast %87 : vector<16xf32> to vector<16x1xf32>
        %89 = arith.index_cast %1 : i32 to index
        %c0_26 = arith.constant 0 : index
        %90 = vector.load %arg13[%89, %c0_26] : memref<32x1xf32, #tpu.memory_space<vmem>>, vector<16x1xf32>
        tpu.vector_store %arg13[%89, %c0_26], %88 {strides = array<i32>} : memref<32x1xf32, #tpu.memory_space<vmem>>, vector<16x1xf32>,
      } else {
      }
      %51 = arith.index_cast %1 : i32 to index
      %c0_15 = arith.constant 0 : index
      %52 = vector.load %arg13[%51, %c0_15] : memref<32x1xf32, #tpu.memory_space<vmem>>, vector<16x1xf32>
      %53 = arith.addf %52, %47 : vector<16x1xf32>
      %54 = arith.index_cast %1 : i32 to index
      %c0_16 = arith.constant 0 : index
      %55 = vector.load %arg13[%54, %c0_16] : memref<32x1xf32, #tpu.memory_space<vmem>>, vector<16x1xf32>
      tpu.vector_store %arg13[%54, %c0_16], %53 {strides = array<i32>} : memref<32x1xf32, #tpu.memory_space<vmem>>, vector<16x1xf32>,
      %c1_i32_17 = arith.constant 1 : i32
      %56 = arith.cmpi eq, %arg1, %c1_i32_17 : i32
      %57 = arith.extui %56 : i1 to i32
      %c0_i32_18 = arith.constant 0 : i32
      %58 = arith.cmpi ne, %57, %c0_i32_18 : i32
      scf.if %58 {
        %59 = arith.index_cast %1 : i32 to index
        %c0_19 = arith.constant 0 : index
        %60 = vector.load %arg13[%59, %c0_19] : memref<32x1xf32, #tpu.memory_space<vmem>>, vector<16x1xf32>
        %61 = arith.index_cast %1 : i32 to index
        %c0_20 = arith.constant 0 : index
        %62 = vector.load %arg12[%61, %c0_20] : memref<32x1xf32, #tpu.memory_space<vmem>>, vector<16x1xf32>
        %cst_21 = arith.constant 1.000000e+00 : f32
        %63 = vector.broadcast %cst_21 : f32 to vector<16x1xf32>
        %64 = arith.maximumf %62, %63 : vector<16x1xf32>
        %65 = arith.divf %60, %64 : vector<16x1xf32>
        %66 = tpu.iota {dimensions = array<i32: 0>} : vector<16x1xi32>
        %67 = vector.broadcast %1 : i32 to vector<16x1xi32>
        %68 = arith.addi %67, %66 : vector<16x1xi32>
        %c24_i32 = arith.constant 24 : i32
        %69 = vector.broadcast %c24_i32 : i32 to vector<16x1xi32>
        %70 = arith.cmpi slt, %68, %69 : vector<16x1xi32>
        %cst_22 = arith.constant 0.000000e+00 : f32
        %71 = vector.broadcast %cst_22 : f32 to vector<16x1xf32>
        %72 = arith.select %70, %65, %71 : vector<16x1xi1>, vector<16x1xf32>
        %73 = vector.shape_cast %72 : vector<16x1xf32> to vector<1x16x1xf32>
        %cst_23 = arith.constant dense<0.000000e+00> : vector<1xf32>
        %74 = vector.multi_reduction <add>, %73, %cst_23 [1, 2] : vector<1x16x1xf32> to vector<1xf32>
        %75 = vector.shape_cast %74 : vector<1xf32> to vector<1x1x1xf32>
        %76 = vector.extract %75[0, 0, 0] : f32 from vector<1x1x1xf32>
        %77 = vector.broadcast %76 : f32 to vector<1x1x1xf32>
        %78 = vector.shape_cast %77 : vector<1x1x1xf32> to vector<1x1x1xf32>
        %79 = vector.broadcast %78 : vector<1x1x1xf32> to vector<1x8x128xf32>
        %c0_24 = arith.constant 0 : index
        %c0_25 = arith.constant 0 : index
        %c0_26 = arith.constant 0 : index
        %80 = vector.load %arg9[%c0_24, %c0_25, %c0_26] : memref<1x8x128xf32, #tpu.memory_space<vmem>>, vector<1x8x128xf32>
        tpu.vector_store %arg9[%c0_24, %c0_25, %c0_26], %79 {strides = array<i32>} : memref<1x8x128xf32, #tpu.memory_space<vmem>>, vector<1x8x128xf32>,
      } else {
      }
    } else {
    }
    return
  }
  func.func @transform_0(%arg0: i32, %arg1: i32, %arg2: i32) -> (i32, i32) {
    %c0_i32 = arith.constant 0 : i32
    %c0_i32_0 = arith.constant 0 : i32
    %c0_i32_1 = arith.constant 0 : i32
    return %c0_i32, %c0_i32_0 : i32, i32
  }
  func.func @transform_1(%arg0: i32, %arg1: i32, %arg2: i32) -> (i32, i32) {
    %c0_i32 = arith.constant 0 : i32
    %c0_i32_0 = arith.constant 0 : i32
    %c0_i32_1 = arith.constant 0 : i32
    return %c0_i32, %c0_i32_0 : i32, i32
  }
  func.func @transform_2(%arg0: i32, %arg1: i32, %arg2: i32) -> (i32, i32) {
    %c0_i32 = arith.constant 0 : i32
    %c0_i32_0 = arith.constant 0 : i32
    return %arg1, %c0_i32 : i32, i32
  }
  func.func @transform_3(%arg0: i32, %arg1: i32, %arg2: i32) -> (i32, i32) {
    %c0_i32 = arith.constant 0 : i32
    %c0_i32_0 = arith.constant 0 : i32
    %c0_i32_1 = arith.constant 0 : i32
    return %c0_i32, %c0_i32_0 : i32, i32
  }
  func.func @transform_4(%arg0: i32, %arg1: i32, %arg2: i32) -> (i32, i32) {
    %c0_i32 = arith.constant 0 : i32
    %c0_i32_0 = arith.constant 0 : i32
    %c0_i32_1 = arith.constant 0 : i32
    return %c0_i32, %c0_i32_0 : i32, i32
  }
  func.func @transform_5(%arg0: i32, %arg1: i32, %arg2: i32) -> (i32, i32) {
    %c0_i32 = arith.constant 0 : i32
    %c0_i32_0 = arith.constant 0 : i32
    return %c0_i32, %arg1 : i32, i32
  }
  func.func @transform_6(%arg0: i32, %arg1: i32, %arg2: i32) -> (i32, i32, i32) {
    %c0_i32 = arith.constant 0 : i32
    %c0_i32_0 = arith.constant 0 : i32
    %c0_i32_1 = arith.constant 0 : i32
    return %arg2, %c0_i32, %c0_i32_0 : i32, i32, i32
  }
}

</mosaic_0001>

<bundles_post_ra>
// kernel: tpu_custom_call.1
= control target key start
LH: loop header
LB: loop body
LE: loop exit
PB: predicated region body
PF: predicated region fallthrough
CT: control target
= control target key end

     0   :  { %s4427_s0 = inlined_call_operand.vmem [shape: f32[32,128], index: 0, kind: input, shape index: {}]   ;;  %s4428_s1 = inlined_call_operand.hbm [shape: f32[32,128], index: 1, kind: input, shape index: {}]   ;;  %s4429_s2 = inlined_call_operand.hbm [shape: f32[256,128], index: 2, kind: input, shape index: {}]   ;;  %s4430_s3 = inlined_call_operand.vmem [shape: s32[32,1], index: 3, kind: input, shape index: {}]   ;;  %s4431_s4 = inlined_call_operand.vmem [shape: s32[1,32], index: 4, kind: input, shape index: {}]   ;;  %s4432_s5 = inlined_call_operand.vmem [shape: s32[1,256], index: 5, kind: input, shape index: {}]   ;;  %s4433_s6 = inlined_call_operand.hbm [shape: f32[2,8,128], index: 6, kind: output, shape index: {}]  }
   0x1   :  { %4446 = sst [smem:[#allocation24_spill]] %s4428_s1 }
   0x2   :  { %4447 = sst [smem:[#allocation25_spill]] %s4431_s4 }
   0x3   :  { %4448 = sst [smem:[#allocation26_spill]] %s4433_s6 }
   0x4   :  { %11 = vsyncpa [#allocation7], 0 }
   0x5   :  { %12 = vsyncpa [#allocation10], 0 }
   0x6   :  { %14 = vsyncpa [#allocation10 + $0x1], 0 }
   0x7   :  { %15 = vsyncpa [#allocation8], 0 }
   0x8   :  { %17 = vsyncpa [#allocation8 + $0x1], 0  ;;  %s3539_s21 = smov 0   ;;  %s3541_s22 = smov 0  }
   0x9   :  { %s3543_s23 = smov 0   ;;  %s3545_s24 = smov 0  }
   0xa   :  { %s3547_s25 = smov 0   ;;  %s3549_s26 = smov 0  }
   0xb   :  { %s3551_s27 = smov 0   ;;  %s3553_s28 = smov 0  }
   0xc   :  { %s3555_s29 = smov 0   ;;  %s3557_s30 = smov 0  }
   0xd   :  { %s3559_s7 = smov 0   ;;  %s3561_s8 = smov 0  }
   0xe   :  { %s3563_s9 = smov 0  }
   0xf LB: > { %4449 = sst [smem:[#allocation15_spill]] %s3443_s21  ;;  %s2555_s10 = sadd.s32 4294967295, %s3491_s9   ;;  %s3491_s9 = sphi %s3563_s9, %s23_s9   ;;  %s3487_s8 = sphi %s3561_s8, %s4487_s8   ;;  %s3483_s7 = sphi %s3559_s7, %s4495_s7   ;;  %s3479_s30 = sphi %s3557_s30, %s4485_s30   ;;  %s3475_s29 = sphi %s3555_s29, %s4484_s29   ;;  %s3471_s28 = sphi %s3553_s28, %s4494_s28   ;;  %s3467_s27 = sphi %s3551_s27, %s4483_s27   ;;  %s3463_s26 = sphi %s3549_s26, %s4493_s26   ;;  %s3459_s25 = sphi %s3547_s25, %s4492_s25   ;;  %s3455_s24 = sphi %s3545_s24, %s4491_s24   ;;  %s3451_s23 = sphi %s3543_s23, %s4490_s23   ;;  %s3447_s22 = sphi %s3541_s22, %s4489_s22   ;;  %s3443_s21 = sphi %s3539_s21, %s4488_s21  }
  0x10   : > { %4450 = sst [smem:[#allocation16_spill]] %s3475_s29  ;;  %s2556_s11 = sadd.s32 4294967294, %s3491_s9  }
  0x11   : > { %4451 = sst [smem:[#allocation17_spill]] %s3479_s30  ;;  %p104_p0 = scmp.ne.s32.totalorder %s3459_s25, %s3455_s24 }
  0x12   : > { %4452 = sst [smem:[#allocation18_spill]] %s3487_s8  ;;  %p3605_p1 = scmp.eq.s32.totalorder %s2555_s10, 0 }
  0x13   : > { %p195_p2 = scmp.ne.s32.totalorder %s3451_s23, %s3447_s22  ;;  %p196_p4 = scmp.eq.s32.totalorder %s2555_s10, 7 }
  0x14   : > { %p3614_p3 = por %p3605_p1, %p104_p0  ;;  %p201_p5 = scmp.ne.s32.totalorder %s3447_s22, %s3443_s21 }
  0x15   : > { %p202_p6 = scmp.eq.s32.totalorder %s2556_s11, 7  ;;  %p3620_p7 = por %p196_p4, %p195_p2 }
  0x16   : > { %p2557_p8 = scmp.ge.s32.totalorder %s3491_s9, 1  ;;  %p209_p10 = scmp.lt.s32.totalorder %s3491_s9, 9 }
  0x17   : > { %s4455_s15 = scalar_select %p3620_p7, 1, 0 }
  0x18   : > { %p3625_p9 = por %p202_p6, %p201_p5  ;;  %p3630_p11 = pnand %p2557_p8, %p209_p10 }
  0x19   : > { %4456 = sst [smem:[#allocation19_spill]] %s4455_s15  ;;  %s3493_s18 = smov [#allocation6]  }
  0x1a   : > { %s4457_s16 = scalar_select %p3625_p9, 1, 0 }
  0x1b   : > { %s224_s19 = sshll.u32 %s3493_s18, 4  ;;  %p3134_p12 = pneg %p3630_p11  ;;  %s225_s19 = int_to_ptr.vmem [resolvable:$true] %s224_s19 }
  0x1c   : > { %4458 = sst [smem:[#allocation20_spill]] %s4457_s16  ;;  %s3308_s20 = scalar_lea.vmem %s225_s19, 512 }
  0x1d   : > { %p3135_p13 = pnand %p3134_p12, %p3605_p1  ;;  %p3309_p2 = scmp.ne.s32.totalorder %s225_s19, %s3308_s20 }
  0x1e   : > { %p3316_p6 = scmp.lt.s32.totalorder %s225_s19, %s225_s19  ;;  %p3317_p9 = scmp.lt.s32.totalorder %s3308_s20, %s3308_s20 }
  0x1f   : > { %p3299_p0 = pneg %p3135_p13 }
  0x20   : > { %p3318_p7 = por %p3317_p9, %p3316_p6 }
  0x21   : > { %p3311_p4 = pnand %p3309_p2, %p3299_p0 }
  0x23   : > { %p3312_p5 = pneg %p3311_p4 }
  0x25   : > { %p3319_p8 = pnand %p3318_p7, %p3312_p5 }
  0x27   : > { %3322 = shalt.err (!%p3319_p8)
}
  0x28   : > { %s4437_s24 = smov 128   ;;  %s4438_s10 = smov 8  }
  0x29   : > { %s4460_s1 = sld [smem:[#allocation24_spill]]  ;;  %s35_s20 = sadd.s32 1, %s3479_s30 }
  0x2a   : > { %p36_p7 = scmp.ge.s32.totalorder %s35_s20, 2  ;;  %s38_s13 = sadd.s32 1, %s3483_s7 }
  0x2b   : > { %s42_s16 = sadd.s32 1, %s3487_s8  ;;  %s91_s21 = sadd.s32 1, %s3463_s26 }
  0x2c   : > { %s4497_s20 = smov (%p36_p7, %s35_s20), 0  ;;  %s4499_s13 = smov (!%p36_p7, %s38_s13), %s3483_s7 }
  0x2d   : > { %4461 = sst [smem:[#allocation21_spill]] %s4497_s20  ;;  %p98_p9 = scmp.ne.s32.totalorder %s3463_s26, %s3459_s25 }
  0x2e   : > { %p99_p10 = scmp.eq.s32.totalorder %s3491_s9, 0  ;;  %p40_p12 = scmp.ge.s32.totalorder %s4499_s13, 2 }
  0x2f   : > { %3137 = dma.hbm_to_vmem [thread:$0]  (!%p3135_p13), %s4460_s1, 512, %s225_s19, [#allocation7], %s4437_s24, %s4437_s24, %s4438_s10  }
  0x30   : > { %s182_s19 = ssub.s32 %s3479_s30, %s4497_s20  ;;  %p3656_p13 = por %p99_p10, %p98_p9 }
  0x31   : > { %p183_p0 = scmp.eq.s32.totalorder %s182_s19, 0  ;;  %s4501_s13 = smov (%p40_p12, %s4499_s13), 0 }
  0x32   : > { %4463 = sst [smem:[#allocation22_spill]] %s4501_s13  ;;  %s4503_s16 = smov (!%p40_p12, %s42_s16), %s3487_s8 }
  0x33   : > { %s88_s18 = ssub.s32 %s3483_s7, %s4501_s13  ;;  %p3147_p2 = scmp.lt.s32.totalorder %s3491_s9, 8 }
  0x34   : > { %p44_p4 = scmp.ge.s32.totalorder %s4503_s16, 2  ;;  %p89_p5 = scmp.eq.s32.totalorder %s88_s18, 0 }
  0x35   : > { %s4464_s24 = sadd.s32 1, %s3451_s23  ;;  %s244_s20 = sand.u32 1, %s3463_s26  }
  0x36   : > { %s3669_s10 = scalar_select %p183_p0, %s3451_s23, %s4464_s24  }
  0x37   : > { %s4505_s16 = smov (%p44_p4, %s4503_s16), 0  ;;  %s2601_s30 = sshll.u32 %s3483_s7, 11 }
  0x38   : > { %4465 = sst [smem:[#allocation23_spill]] %s4505_s16  ;;  %s2560_s6 = sshll.u32 %s244_s20, 7 }
  0x39   : > { %s3674_s1 = scalar_select %p89_p5, %s3463_s26, %s91_s21  }
  0x3a   : > { %s254_s4 = scalar_lea.hbm %s4429_s2, %s2601_s30  ;;  %s248_s29 = scalar_lea.vmem [#allocation9], %s2560_s6 }
  0x3b   : > { %s255_s8 = sshll.u32 %s248_s29, 4  ;;  %p3683_p6 = pnand %p3147_p2, %p3656_p13  ;;  %s256_s8 = int_to_ptr.vmem [resolvable:$true] %s255_s8 }
  0x3c   : > { %s245_s24 = scalar_lea.sflag [#allocation10], %s244_s20  ;;  %s3336_s21 = scalar_lea.vmem %s256_s8, 2048 }
  0x3d   : > { %p3325_p8 = pneg %p3683_p6  ;;  %p3337_p7 = scmp.ne.s32.totalorder %s256_s8, %s3336_s21 }
  0x3e   : > { %s3496_s18 = smov [#allocation9]  }
  0x3f   : > { %p3339_p9 = pnand %p3337_p7, %p3325_p8  ;;  %s3341_s16 = sshll.u32 %s3496_s18, 4  ;;  %s3342_s16 = int_to_ptr.vmem [resolvable:$false] %s3341_s16 }
  0x40   : > { %s3343_s30 = scalar_lea.vmem %s3342_s16, 4096  ;;  %p3344_p12 = scmp.lt.s32.totalorder %s256_s8, %s3342_s16 }
  0x41   : > { %p3340_p10 = pneg %p3339_p9  ;;  %p3345_p0 = scmp.lt.s32.totalorder %s3343_s30, %s3336_s21 }
  0x43   : > { %p3346_p4 = por %p3345_p0, %p3344_p12 }
  0x45   : > { %p3347_p13 = pnand %p3346_p4, %p3340_p10 }
  0x47   : > { %3350 = shalt.err (!%p3347_p13)
}
  0x48   : > { %s4467_s6 = smov 8   ;;  %s4468_s29 = smov 128  }
  0x49   : > { %3141 = dma.hbm_to_vmem [thread:$0]  (!%p3683_p6), %s254_s4, 2048, %s256_s8, %s245_s24, %s4468_s29, %s4468_s29, %s4467_s6  }
  0x4a   : > { %273 = sbr.rel (%p3630_p11) target bundleno = 2113 (0x841), region = 44 }
  0x4f   : > { %3430 = dma.done.wait (%p3605_p1), [#allocation7], 512  }
  0x50   : > { %3432 = vsyncadd (%p3605_p1), [#allocation7], 4294966784  ;;  %s279_s15 = sand.u32 1, %s3459_s25  }
  0x51   : > { %s2565_s16 = sshll.u32 %s279_s15, 7  ;;  %s280_s20 = scalar_lea.sflag [#allocation10], %s279_s15 }
  0x52   : > { %s3701_s11 = scalar_lea.vmem [#allocation9], %s2565_s16 }
  0x53   : > { %3434 = dma.done.wait (%p3614_p3), %s280_s20, 2048  }
  0x54   : > { %3436 = vsyncadd (%p3614_p3), %s280_s20, 4294965248  ;;  %s312_s4 = sand.u32 1, %s3447_s22   ;;  %v341_v0 = vld [vmem:[%s3701_s11 + $0x78] sm:$0xff]  ;;  %v340_v1 = vld [vmem:[%s3701_s11 + $0x70] sm:$0xff]  ;;  %s3757_s12 = sshll.u32 %s3467_s27, 4 }
  0x55   : > { %s3710_s8 = sshll.u32 %s312_s4, 3  ;;  %v339_v2 = vld [vmem:[%s3701_s11 + $0x68] sm:$0xff]  ;;  %v3715_v3 = vand.u32 4294901760, %v341_v0  ;;  %v3717_v4 = vand.u32 4294901760, %v340_v1  ;;  %v338_v6 = vld [vmem:[%s3701_s11 + $0x60] sm:$0xff]  ;;  %v337_v7 = vld [vmem:[%s3701_s11 + $0x58] sm:$0xff]  ;;  %s3776_s17 = scalar_lea.vmem %s4427_s0, %s3757_s12 }
  0x56   : > { %v3719_v5 = vand.u32 4294901760, %v339_v2  ;;  %v3723_v8 = vand.u32 4294901760, %v338_v6  ;;  %v3736_v12 = vand.u32 4294901760, %v337_v7  ;;  %v336_v16 = vld [vmem:[%s3701_s11 + $0x50] sm:$0xff]  ;;  %v335_v26 = vld [vmem:[%s3701_s11 + $0x48] sm:$0xff]  ;;  %v334_v31 = vld [vmem:[%s3701_s11 + $0x40] sm:$0xff]  ;;  %s3970_s21 = scalar_lea.vmem %s4430_s3, %s3757_s12 }
  0x57   : > { %2782 = vmatprep.subr.mxu0 %v3715_v3  ;;  %v3727_v9 = vsub.f32 %v341_v0, %v3715_v3  ;;  %v3730_v10 = vsub.f32 %v340_v1, %v3717_v4  ;;  %v3760_v20 = vand.u32 4294901760, %v336_v16  ;;  %v3779_v27 = vand.u32 4294901760, %v335_v26  ;;  %v321_v33 = vld [vmem:[%s3776_s17] sm:$0xff]  ;;  %v333_v39 = vld [vmem:[%s3701_s11 + $0x38] sm:$0xff]  ;;  %v332_v47 = vld [vmem:[%s3701_s11 + $0x30] sm:$0xff]  ;;  %p316_p1 = scmp.lt.s32.totalorder %s3471_s28, 1 }
  0x58   : > { %v3733_v11 = vsub.f32 %v339_v2, %v3719_v5  ;;  %2783 = vmatpush3.xpose.msra.mxu0 %v3715_v3  ;;  %v3750_v17 = vsub.f32 %v338_v6, %v3723_v8  ;;  %v3763_v21 = vsub.f32 %v337_v7, %v3736_v12  ;;  %v3793_v34 = vand.u32 4294901760, %v334_v31  ;;  %v331_v55 = vld [vmem:[%s3701_s11 + $0x28] sm:$0xff]  ;;  %v330_v61 = vld [vmem:[%s3701_s11 + $0x20] sm:$0xff]  ;;  %v329_v6 = vld [vmem:[%s3701_s11 + $0x18] sm:$0xff]  ;;  %s2568_s18 = sshll.u32 %s3471_s28, 7  ;;  %s314_s16 = scalar_lea.vmem [#allocation11], %s3710_s8 }
  0x59   : > { %2784 = vmatprep.subr.mxu0 %v3717_v4  ;;  %v3740_v13 = vand.u32 4294901760, %v3727_v9  ;;  %v3743_v14 = vand.u32 4294901760, %v3730_v10  ;;  %v3789_v32 = vsub.f32 %v336_v16, %v3760_v20  ;;  %v3795_v35 = vand.u32 4294901760, %v321_v33  ;;  %s317_s30 = scalar_select %p316_p1, %s3471_s28, 1 }
  0x5a   : > { %v3746_v15 = vand.u32 4294901760, %v3733_v11  ;;  %v3769_v25 = vand.u32 4294901760, %v3750_v17  ;;  %v3785_v30 = vand.u32 4294901760, %v3763_v21  ;;  %v3805_v40 = vsub.f32 %v335_v26, %v3779_v27  ;;  %s4469_s20 = sld [smem:[#allocation16_spill]] }
  0x5b   : > { %v447_v18 = vsub.f32 %v3727_v9, %v3740_v13  ;;  %v454_v19 = vsub.f32 %v3730_v10, %v3743_v14  ;;  %v3801_v38 = vand.u32 4294901760, %v3789_v32  ;;  %v3808_v41 = vsub.f32 %v321_v33, %v3795_v35  ;;  %2849 = vmatprep.mubr.f32.mxu1 %v3795_v35  ;;  %v327_v33 = vld [vmem:[%s3701_s11 + $0x8] sm:$0xff]  ;;  %s318_s15 = scalar_lea.vmem %s4432_s5, %s317_s30 }
  0x5c   : > { %2785 = vmatpush3.xpose.msra.mxu0 %v3717_v4  ;;  %v461_v24 = vsub.f32 %v3733_v11, %v3746_v15  ;;  %v468_v29 = vsub.f32 %v3750_v17, %v3769_v25  ;;  %v475_v37 = vsub.f32 %v3763_v21, %v3785_v30  ;;  %v3812_v42 = vand.u32 4294901760, %v333_v39 }
  0x5d   : > { %2786 = vmatprep.subr.mxu0 %v3719_v5  ;;  %v448_v22 = vand.u32 4294901760, %v447_v18  ;;  %v455_v23 = vand.u32 4294901760, %v454_v19  ;;  %v3815_v43 = vand.u32 4294901760, %v3808_v41  ;;  %v482_v45 = vsub.f32 %v3789_v32, %v3801_v38 }
  0x5e   : > { %v462_v28 = vand.u32 4294901760, %v461_v24  ;;  %v469_v36 = vand.u32 4294901760, %v468_v29  ;;  %v476_v44 = vand.u32 4294901760, %v475_v37  ;;  %v3821_v46 = vand.u32 4294901760, %v3805_v40 }
  0x5f   : > { %2817 = vmatprep.subr.mxu1 %v448_v22  ;;  %v3825_v48 = vsub.f32 %v334_v31, %v3793_v34  ;;  %v426_v49 = vsub.f32 %v3808_v41, %v3815_v43  ;;  %v3830_v50 = vand.u32 4294901760, %v332_v47  ;;  %v483_v52 = vand.u32 4294901760, %v482_v45 }
  0x60   : > { %2787 = vmatpush3.xpose.msra.mxu0 %v3719_v5  ;;  %2818 = vmatpush3.xpose.msra.mxu1 %v448_v22  ;;  %v489_v53 = vsub.f32 %v3805_v40, %v3821_v46  ;;  %v3842_v56 = vsub.f32 %v333_v39, %v3812_v42  ;;  %v3846_v57 = vand.u32 4294901760, %v331_v55  ;;  %v3859_v63 = vand.u32 4294901760, %v330_v61  ;;  %v322_v39 = vld [vmem:[%s3776_s17 + $0x8] sm:$0xff]  ;;  %p2572_p3 = scmp.ne.s32.totalorder %s4469_s20, 0 }
  0x61   : > { %2788 = vmatprep.subr.mxu0 %v3723_v8  ;;  %2819 = vmatprep.subr.mxu1 %v455_v23  ;;  %v3832_v51 = vand.u32 4294901760, %v426_v49  ;;  %v3838_v54 = vand.u32 4294901760, %v3825_v48  ;;  %v3856_v62 = vsub.f32 %v332_v47, %v3830_v50  ;;  %v3872_v16 = vand.u32 4294901760, %v329_v6  ;;  %v326_v49 = vld [vmem:[%s3701_s11] sm:$0xff]  ;;  %p2576_p11 = scmp.ne.s32.totalorder (!%p2572_p3), %s3471_s28, 0 }
  0x62   : > { %v490_v58 = vand.u32 4294901760, %v489_v53  ;;  %v3852_v60 = vand.u32 4294901760, %v3842_v56  ;;  %v3869_v7 = vsub.f32 %v331_v55, %v3846_v57  ;;  %v3882_v24 = vsub.f32 %v330_v61, %v3859_v63 }
  0x63   : > { %2814 = vmatprep.mubr.f32.mxu0 %v3832_v51  ;;  %v496_v59 = vsub.f32 %v3825_v48, %v3838_v54  ;;  %v3865_v2 = vand.u32 4294901760, %v3856_v62  ;;  %v3898_v37 = vand.u32 4294901760, %v327_v33  ;;  %v3911_v53 = vand.u32 4294901760, %v322_v39 }
  0x64   : > { %2789 = vmatpush3.xpose.msra.mxu0 %v3723_v8  ;;  %2820 = vmatpush3.xpose.msra.mxu1 %v455_v23  ;;  %v503_v1 = vsub.f32 %v3842_v56, %v3852_v60  ;;  %v3878_v22 = vand.u32 4294901760, %v3869_v7  ;;  %v328_v23 = vld [vmem:[%s3701_s11 + $0x10] sm:$0xff]  ;;  %v3891_v31 = vand.u32 4294901760, %v3882_v24  ;;  %v3914_v55 = vand.u32 4294901760, %v326_v49 }
  0x65   : > { %2790 = vmatprep.subr.mxu0 %v3736_v12  ;;  %2821 = vmatprep.subr.mxu1 %v462_v28  ;;  %v497_v0 = vand.u32 4294901760, %v496_v59  ;;  %v510_v19 = vsub.f32 %v3856_v62, %v3865_v2  ;;  %v3885_v26 = vand.u32 4294901760, %v328_v23 }
  0x66   : > { %v504_v18 = vand.u32 4294901760, %v503_v1  ;;  %v517_v29 = vsub.f32 %v3869_v7, %v3878_v22  ;;  %v524_v45 = vsub.f32 %v3882_v24, %v3891_v31  ;;  %v3926_v1 = vsub.f32 %v322_v39, %v3911_v53 }
  0x68   : > { %2791 = vmatpush3.xpose.msra.mxu0 %v3736_v12  ;;  %2822 = vmatpush3.xpose.msra.mxu1 %v462_v28  ;;  %v511_v28 = vand.u32 4294901760, %v510_v19 }
  0x69   : > { %2792 = vmatprep.subr.mxu0 %v3760_v20  ;;  %2823 = vmatprep.subr.mxu1 %v469_v36 }
  0x6c   : > { %2793 = vmatpush3.xpose.msra.mxu0 %v3760_v20  ;;  %2824 = vmatpush3.xpose.msra.mxu1 %v469_v36  ;;  %v3895_v36 = vsub.f32 %v329_v6, %v3872_v16 }
  0x6d   : > { %2794 = vmatprep.subr.mxu0 %v3779_v27  ;;  %2825 = vmatprep.subr.mxu1 %v476_v44 }
  0x6e   : > { %v3905_v47 = vand.u32 4294901760, %v3895_v36 }
  0x70   : > { %2795 = vmatpush3.xpose.msra.mxu0 %v3779_v27  ;;  %2826 = vmatpush3.xpose.msra.mxu1 %v476_v44  ;;  %v518_v44 = vand.u32 4294901760, %v517_v29  ;;  %v531_v59 = vsub.f32 %v3895_v36, %v3905_v47 }
  0x71   : > { %2796 = vmatprep.subr.mxu0 %v3793_v34  ;;  %2827 = vmatprep.subr.mxu1 %v483_v52 }
  0x72   : > { %v532_v6 = vand.u32 4294901760, %v531_v59 }
  0x74   : > { %2797 = vmatpush3.xpose.msra.mxu0 %v3793_v34  ;;  %2828 = vmatpush3.xpose.msra.mxu1 %v483_v52  ;;  %v3909_v52 = vsub.f32 %v328_v23, %v3885_v26  ;;  %v3936_v23 = vsub.f32 %v326_v49, %v3914_v55 }
  0x75   : > { %2798 = vmatprep.subr.mxu0 %v3812_v42  ;;  %2829 = vmatprep.subr.mxu1 %v490_v58 }
  0x76   : > { %v3920_v61 = vand.u32 4294901760, %v3909_v52  ;;  %v3946_v39 = vand.u32 4294901760, %v3936_v23 }
  0x78   : > { %2799 = vmatpush3.xpose.msra.mxu0 %v3812_v42  ;;  %2830 = vmatpush3.xpose.msra.mxu1 %v490_v58  ;;  %v525_v58 = vand.u32 4294901760, %v524_v45  ;;  %v552_v49 = vsub.f32 %v3936_v23, %v3946_v39 }
  0x79   : > { %2800 = vmatprep.subr.mxu0 %v3830_v50  ;;  %2831 = vmatprep.subr.mxu1 %v497_v0 }
  0x7a   : > { %v553_v59 = vand.u32 4294901760, %v552_v49 }
  0x7c   : > { %2801 = vmatpush3.xpose.msra.mxu0 %v3830_v50  ;;  %2832 = vmatpush3.xpose.msra.mxu1 %v497_v0  ;;  %v3923_v0 = vsub.f32 %v327_v33, %v3898_v37 }
  0x7d   : > { %2802 = vmatprep.subr.mxu0 %v3846_v57  ;;  %2833 = vmatprep.subr.mxu1 %v504_v18 }
  0x7e   : > { %v3933_v19 = vand.u32 4294901760, %v3923_v0 }
  0x80   : > { %2803 = vmatpush3.xpose.msra.mxu0 %v3846_v57  ;;  %2834 = vmatpush3.xpose.msra.mxu1 %v504_v18  ;;  %v538_v18 = vsub.f32 %v3909_v52, %v3920_v61  ;;  %v545_v33 = vsub.f32 %v3923_v0, %v3933_v19 }
  0x81   : > { %2804 = vmatprep.subr.mxu0 %v3859_v63  ;;  %2835 = vmatprep.subr.mxu1 %v511_v28 }
  0x82   : > { %v539_v29 = vand.u32 4294901760, %v538_v18  ;;  %v546_v45 = vand.u32 4294901760, %v545_v33 }
  0x84   : > { %2805 = vmatpush3.xpose.msra.mxu0 %v3859_v63  ;;  %2836 = vmatpush3.xpose.msra.mxu1 %v511_v28  ;;  %v3939_v28 = vand.u32 4294901760, %v3926_v1 }
  0x85   : > { %2806 = vmatprep.subr.mxu0 %v3872_v16  ;;  %2837 = vmatprep.subr.mxu1 %v518_v44 }
  0x88   : > { %2807 = vmatpush3.xpose.msra.mxu0 %v3872_v16  ;;  %2838 = vmatpush3.xpose.msra.mxu1 %v518_v44  ;;  %v436_v44 = vsub.f32 %v3926_v1, %v3939_v28 }
  0x89   : > { %2808 = vmatprep.subr.mxu0 %v3885_v26  ;;  %2839 = vmatprep.subr.mxu1 %v525_v58 }
  0x8c   : > { %2809 = vmatpush3.xpose.msra.mxu0 %v3885_v26  ;;  %2840 = vmatpush3.xpose.msra.mxu1 %v525_v58  ;;  %v3954_v58 = vand.u32 4294901760, %v436_v44 }
  0x8d   : > { %2810 = vmatprep.subr.mxu0 %v3898_v37  ;;  %2841 = vmatprep.subr.mxu1 %v532_v6 }
  0x90   : > { %2811 = vmatpush3.xpose.msra.mxu0 %v3898_v37  ;;  %2842 = vmatpush3.xpose.msra.mxu1 %v532_v6 }
  0x91   : > { %2812 = vmatprep.subr.mxu0 %v3914_v55  ;;  %2843 = vmatprep.subr.mxu1 %v539_v29 }
  0x94   : > { %2813 = vmatpush3.xpose.msra.mxu0 %v3914_v55  ;;  %2844 = vmatpush3.xpose.msra.mxu1 %v539_v29 }
  0x95   : > { %2845 = vmatprep.subr.mxu1 %v546_v45  ;;  %2852 = vmatprep.subr.mxu0 %v3727_v9 }
  0x97   : > { %2815 = vmatmul.mubr.f32.vlgmr.msra.gmra.mxu0 %v3954_v58 }
  0x98   : > { %2846 = vmatpush3.xpose.msra.mxu1 %v546_v45  ;;  %2853 = vmatpush3.xpose.msra.mxu0 %v3727_v9  ;;  %v324_v9 = vld [vmem:[%s3970_s21] sm:$0xff] }
  0x99   : > { %2847 = vmatprep.subr.mxu1 %v553_v59  ;;  %2854 = vmatprep.subr.mxu0 %v3730_v10 }
  0x9a   : > { %2884 = vmatprep.mubr.f32.mxu0 %v3808_v41 }
  0x9c   : > { %2848 = vmatpush3.xpose.msra.mxu1 %v553_v59  ;;  %2855 = vmatpush3.xpose.msra.mxu0 %v3730_v10  ;;  %v3497_v10 = vmov 0  }
  0x9d   : > { %2856 = vmatprep.subr.mxu0 %v3733_v11  ;;  %2887 = vmatprep.subr.mxu1 %v3715_v3 }
  0x9e   : > { %3263 = vset.pattern.permute.xlu0 %v3497_v10 }
  0x9f   : > { %2850 = vmatmul.mubr.f32.vlgmr.msra.gmra.mxu1 %v3911_v53  ;;  %1034 = vperm.xlu0 %3263, %v324_v9  }
  0xa0   : > { %2857 = vmatpush3.xpose.msra.mxu0 %v3733_v11  ;;  %2888 = vmatpush3.xpose.msra.mxu1 %v3715_v3  ;;  %v325_v11 = vld [vmem:[%s3970_s21 + $0x8] sm:$0xff] }
  0xa1   : > { %2858 = vmatprep.subr.mxu0 %v3750_v17  ;;  %2889 = vmatprep.subr.mxu1 %v3717_v4 }
  0xa2   : > { %2919 = vmatprep.mubr.f32.mxu1 %v3815_v43 }
  0xa3   : > { %1037 = vperm.xlu0 %3263, %v325_v11  }
  0xa4   : > { %2859 = vmatpush3.xpose.msra.mxu0 %v3750_v17  ;;  %2890 = vmatpush3.xpose.msra.mxu1 %v3717_v4 }
  0xa5   : > { %2860 = vmatprep.subr.mxu0 %v3763_v21  ;;  %2891 = vmatprep.subr.mxu1 %v3719_v5 }
  0xa8   : > { %2861 = vmatpush3.xpose.msra.mxu0 %v3763_v21  ;;  %2892 = vmatpush3.xpose.msra.mxu1 %v3719_v5 }
  0xa9   : > { %2862 = vmatprep.subr.mxu0 %v3789_v32  ;;  %2893 = vmatprep.subr.mxu1 %v3723_v8 }
  0xac   : > { %2863 = vmatpush3.xpose.msra.mxu0 %v3789_v32  ;;  %2894 = vmatpush3.xpose.msra.mxu1 %v3723_v8 }
  0xad   : > { %2864 = vmatprep.subr.mxu0 %v3805_v40  ;;  %2895 = vmatprep.subr.mxu1 %v3736_v12 }
  0xb0   : > { %2865 = vmatpush3.xpose.msra.mxu0 %v3805_v40  ;;  %2896 = vmatpush3.xpose.msra.mxu1 %v3736_v12 }
  0xb1   : > { %2866 = vmatprep.subr.mxu0 %v3825_v48  ;;  %2897 = vmatprep.subr.mxu1 %v3760_v20 }
  0xb4   : > { %2867 = vmatpush3.xpose.msra.mxu0 %v3825_v48  ;;  %2898 = vmatpush3.xpose.msra.mxu1 %v3760_v20 }
  0xb5   : > { %2868 = vmatprep.subr.mxu0 %v3842_v56  ;;  %2899 = vmatprep.subr.mxu1 %v3779_v27 }
  0xb8   : > { %2869 = vmatpush3.xpose.msra.mxu0 %v3842_v56  ;;  %2900 = vmatpush3.xpose.msra.mxu1 %v3779_v27 }
  0xb9   : > { %2870 = vmatprep.subr.mxu0 %v3856_v62  ;;  %2901 = vmatprep.subr.mxu1 %v3793_v34 }
  0xbc   : > { %2871 = vmatpush3.xpose.msra.mxu0 %v3856_v62  ;;  %2902 = vmatpush3.xpose.msra.mxu1 %v3793_v34 }
  0xbd   : > { %2872 = vmatprep.subr.mxu0 %v3869_v7  ;;  %2903 = vmatprep.subr.mxu1 %v3812_v42 }
  0xc0   : > { %2873 = vmatpush3.xpose.msra.mxu0 %v3869_v7  ;;  %2904 = vmatpush3.xpose.msra.mxu1 %v3812_v42 }
  0xc1   : > { %2874 = vmatprep.subr.mxu0 %v3882_v24  ;;  %2905 = vmatprep.subr.mxu1 %v3830_v50 }
  0xc4   : > { %2875 = vmatpush3.xpose.msra.mxu0 %v3882_v24  ;;  %2906 = vmatpush3.xpose.msra.mxu1 %v3830_v50 }
  0xc5   : > { %2876 = vmatprep.subr.mxu0 %v3895_v36  ;;  %2907 = vmatprep.subr.mxu1 %v3846_v57 }
  0xc8   : > { %2877 = vmatpush3.xpose.msra.mxu0 %v3895_v36  ;;  %2908 = vmatpush3.xpose.msra.mxu1 %v3846_v57 }
  0xc9   : > { %2878 = vmatprep.subr.mxu0 %v3909_v52  ;;  %2909 = vmatprep.subr.mxu1 %v3859_v63 }
  0xcc   : > { %2879 = vmatpush3.xpose.msra.mxu0 %v3909_v52  ;;  %2910 = vmatpush3.xpose.msra.mxu1 %v3859_v63 }
  0xcd   : > { %2880 = vmatprep.subr.mxu0 %v3923_v0  ;;  %2911 = vmatprep.subr.mxu1 %v3872_v16 }
  0xd0   : > { %2881 = vmatpush3.xpose.msra.mxu0 %v3923_v0  ;;  %2912 = vmatpush3.xpose.msra.mxu1 %v3872_v16 }
  0xd1   : > { %2882 = vmatprep.subr.mxu0 %v3936_v23  ;;  %2913 = vmatprep.subr.mxu1 %v3885_v26 }
  0xd4   : > { %2883 = vmatpush3.xpose.msra.mxu0 %v3936_v23  ;;  %2914 = vmatpush3.xpose.msra.mxu1 %v3885_v26 }
  0xd5   : > { %2915 = vmatprep.subr.mxu1 %v3898_v37  ;;  %2922 = vmatprep.subr.mxu0 %v3740_v13 }
  0xd7   : > { %2885 = vmatmul.mubr.f32.vlgmr.msra.gmra.mxu0 %v3926_v1 }
  0xd8   : > { %2916 = vmatpush3.xpose.msra.mxu1 %v3898_v37  ;;  %2923 = vmatpush3.xpose.msra.mxu0 %v3740_v13 }
  0xd9   : > { %2917 = vmatprep.subr.mxu1 %v3914_v55  ;;  %2924 = vmatprep.subr.mxu0 %v3743_v14 }
  0xda   : > { %2954 = vmatprep.mubr.f32.mxu0 %v3795_v35 }
  0xdc   : > { %2918 = vmatpush3.xpose.msra.mxu1 %v3914_v55  ;;  %2925 = vmatpush3.xpose.msra.mxu0 %v3743_v14  ;;  %v3498_v14 = vmov 0.0  }
  0xdd   : > { %2926 = vmatprep.subr.mxu0 %v3746_v15  ;;  %2957 = vmatprep.subr.mxu1 %v3715_v3 }
  0xdf   : > { %2920 = vmatmul.mubr.f32.vlgmr.msra.gmra.mxu1 %v3939_v28 }
  0xe0   : > { %2927 = vmatpush3.xpose.msra.mxu0 %v3746_v15  ;;  %2958 = vmatpush3.xpose.msra.mxu1 %v3715_v3  ;;  %v1027_v3 = vlaneseq }
  0xe1   : > { %2928 = vmatprep.subr.mxu0 %v3769_v25  ;;  %2959 = vmatprep.subr.mxu1 %v3717_v4 }
  0xe2   : > { %2989 = vmatprep.mubr.f32.mxu1 %v3795_v35 }
  0xe4   : > { %2929 = vmatpush3.xpose.msra.mxu0 %v3769_v25  ;;  %2960 = vmatpush3.xpose.msra.mxu1 %v3717_v4  ;;  %v1029_v4 = vstv %s2568_s18 }
  0xe5   : > { %2930 = vmatprep.subr.mxu0 %v3785_v30  ;;  %2961 = vmatprep.subr.mxu1 %v3719_v5 }
  0xe8   : > { %2931 = vmatpush3.xpose.msra.mxu0 %v3785_v30  ;;  %2962 = vmatpush3.xpose.msra.mxu1 %v3719_v5  ;;  %v4107_v5 = vand.u32 127, %v1027_v3 }
  0xe9   : > { %2932 = vmatprep.subr.mxu0 %v3801_v38  ;;  %2963 = vmatprep.subr.mxu1 %v3723_v8 }
  0xec   : > { %2933 = vmatpush3.xpose.msra.mxu0 %v3801_v38  ;;  %2964 = vmatpush3.xpose.msra.mxu1 %v3723_v8  ;;  %v1030_v8 = vadd.s32 %v1029_v4, %v4107_v5 }
  0xed   : > { %2934 = vmatprep.subr.mxu0 %v3821_v46  ;;  %2965 = vmatprep.subr.mxu1 %v3736_v12 }
  0xee   : > { %vm1031_vm0 = vcmp.lt.s32.totalorder %v1030_v8, 200 }
  0xf0   : > { %2935 = vmatpush3.xpose.msra.mxu0 %v3821_v46  ;;  %2966 = vmatpush3.xpose.msra.mxu1 %v3736_v12  ;;  %v2569_v12 = vld [vmem:[%s318_s15] ss:$0 sm:$0xff] }
  0xf1   : > { %2936 = vmatprep.subr.mxu0 %v3838_v54  ;;  %2967 = vmatprep.subr.mxu1 %v3760_v20 }
  0xf4   : > { %2937 = vmatpush3.xpose.msra.mxu0 %v3838_v54  ;;  %2968 = vmatpush3.xpose.msra.mxu1 %v3760_v20 }
  0xf5   : > { %2938 = vmatprep.subr.mxu0 %v3852_v60  ;;  %2969 = vmatprep.subr.mxu1 %v3779_v27 }
  0xf8   : > { %2939 = vmatpush3.xpose.msra.mxu0 %v3852_v60  ;;  %2970 = vmatpush3.xpose.msra.mxu1 %v3779_v27 }
  0xf9   : > { %2940 = vmatprep.subr.mxu0 %v3865_v2  ;;  %2971 = vmatprep.subr.mxu1 %v3793_v34 }
  0xfc   : > { %2941 = vmatpush3.xpose.msra.mxu0 %v3865_v2  ;;  %2972 = vmatpush3.xpose.msra.mxu1 %v3793_v34 }
  0xfd   : > { %2942 = vmatprep.subr.mxu0 %v3878_v22  ;;  %2973 = vmatprep.subr.mxu1 %v3812_v42 }
 0x100   : > { %2943 = vmatpush3.xpose.msra.mxu0 %v3878_v22  ;;  %2974 = vmatpush3.xpose.msra.mxu1 %v3812_v42 }
 0x101   : > { %2944 = vmatprep.subr.mxu0 %v3891_v31  ;;  %2975 = vmatprep.subr.mxu1 %v3830_v50 }
 0x104   : > { %2945 = vmatpush3.xpose.msra.mxu0 %v3891_v31  ;;  %2976 = vmatpush3.xpose.msra.mxu1 %v3830_v50 }
 0x105   : > { %2946 = vmatprep.subr.mxu0 %v3905_v47  ;;  %2977 = vmatprep.subr.mxu1 %v3846_v57 }
 0x108   : > { %2947 = vmatpush3.xpose.msra.mxu0 %v3905_v47  ;;  %2978 = vmatpush3.xpose.msra.mxu1 %v3846_v57 }
 0x109   : > { %2948 = vmatprep.subr.mxu0 %v3920_v61  ;;  %2979 = vmatprep.subr.mxu1 %v3859_v63 }
 0x10c   : > { %2949 = vmatpush3.xpose.msra.mxu0 %v3920_v61  ;;  %2980 = vmatpush3.xpose.msra.mxu1 %v3859_v63 }
 0x10d   : > { %2950 = vmatprep.subr.mxu0 %v3933_v19  ;;  %2981 = vmatprep.subr.mxu1 %v3872_v16 }
 0x110   : > { %2951 = vmatpush3.xpose.msra.mxu0 %v3933_v19  ;;  %2982 = vmatpush3.xpose.msra.mxu1 %v3872_v16 }
 0x111   : > { %2952 = vmatprep.subr.mxu0 %v3946_v39  ;;  %2983 = vmatprep.subr.mxu1 %v3885_v26 }
 0x114   : > { %2953 = vmatpush3.xpose.msra.mxu0 %v3946_v39  ;;  %2984 = vmatpush3.xpose.msra.mxu1 %v3885_v26 }
 0x115   : > { %2985 = vmatprep.subr.mxu1 %v3898_v37 }
 0x117   : > { %2955 = vmatmul.mubr.f32.vlgmr.msra.gmra.mxu0 %v3911_v53 }
 0x118   : > { %2986 = vmatpush3.xpose.msra.mxu1 %v3898_v37 }
 0x119   : > { %2987 = vmatprep.subr.mxu1 %v3914_v55 }
 0x11a   : > { %v4113_v13 = vpop.permute.xlu0 %1034 }
 0x11b   : > { %vm1043_vm1 = vcmp.eq.s32.totalorder %v4113_v13, %v2569_v12 }
 0x11c   : > { %2988 = vmatpush3.xpose.msra.mxu1 %v3914_v55  ;;  %vm1047_vm2 = vmand %vm1043_vm1, %vm1031_vm0 }
 0x11d   : > { %v4117_v15 = vsel %vm1047_vm2, 1.0, %v3498_v14 }
 0x11e   : > { %v4119_v17 = vpop.permute.xlu0 %1037 }
 0x11f   : > { %2990 = vmatmul.mubr.f32.vlgmr.msra.gmra.mxu1 %v3911_v53  ;;  %vm1044_vm3 = vcmp.eq.s32.totalorder %v4119_v17, %v2569_v12 }
 0x120   : > { %vm1048_vm4 = vmand %vm1044_vm3, %vm1031_vm0 }
 0x121   : > { %v4123_v20 = vsel %vm1048_vm4, 1.0, %v3498_v14 }
 0x157   : > { %v2816_v21 = vpop.f32.mrf.mxu0 }
 0x159   : > { %v429_v25 = vpop.f32.mrf.mxu0 }
 0x15f   : > { %v2851_v27 = vpop.f32.mrf.mxu1 }
 0x160   : > { %v597_v40 = vadd.f32 %v2851_v27, %v2816_v21 }
 0x161   : > { %v590_v32 = vpop.f32.mrf.mxu1 }
 0x162   : > { %v591_v46 = vadd.f32 %v590_v32, %v429_v25 }
 0x197   : > { %v2886_v30 = vpop.f32.mrf.mxu0 }
 0x198   : > { %v708_v48 = vadd.f32 %v2886_v30, %v597_v40 }
 0x199   : > { %v700_v34 = vpop.f32.mrf.mxu0 }
 0x19a   : > { %v701_v54 = vadd.f32 %v700_v34, %v591_v46 }
 0x19f   : > { %v2921_v38 = vpop.f32.mrf.mxu1 }
 0x1a0   : > { %v805_v56 = vadd.f32 %v2921_v38, %v708_v48 }
 0x1a1   : > { %v796_v50 = vpop.f32.mrf.mxu1 }
 0x1a2   : > { %v797_v60 = vadd.f32 %v796_v50, %v701_v54 }
 0x1d7   : > { %v2956_v42 = vpop.f32.mrf.mxu0 }
 0x1d8   : > { %v930_v62 = vadd.f32 %v2956_v42, %v805_v56 }
 0x1d9   : > { %v923_v57 = vpop.f32.mrf.mxu0 }
 0x1da   : > { %v924_v2 = vadd.f32 %v923_v57, %v797_v60 }
 0x1de   : > { %1056 = sbr.rel (%p2572_p3) target bundleno = 1087 (0x43f), region = 56 }
 0x1df   : > { %v2991_v63 = vpop.f32.mrf.mxu1 }
 0x1e0   : > { %v4125_v7 = vadd.f32 %v2991_v63, %v930_v62 }
 0x1e1   : > { %v1016_v16 = vpop.f32.mrf.mxu1 }
 0x1e2   : > { %v4127_v22 = vadd.f32 %v1016_v16, %v924_v2 }
 0x1e3   : > { %v2574_v31 = vadd.f32 -20.0, %v4125_v7  ;;  %v1073_v37 = vsel %vm1031_vm0, %v4125_v7, -1e+30  ;;  %v3499_v52 = vmov 0.0   ;;  %s4470_s14 = sld [smem:[#allocation25_spill]] (!%p2576_p11)  ;;  %s1681_s17 = scalar_lea.vmem (!%p2576_p11), [#allocation2], %s3757_s12 }
 0x1e4   : > { %v1072_v24 = vsel %vm1031_vm0, %v4127_v22, -1e+30  ;;  %v2573_v26 = vadd.f32 -20.0, %v4127_v22  ;;  %v2575_v55 = vsel %vm1031_vm0, 1.0, %v3499_v52  ;;  %s1692_s19 = scalar_lea.vmem (!%p2576_p11), [#allocation4], %s3757_s12  ;;  %s1687_s24 = scalar_lea.vmem (!%p2576_p11), [#allocation3], %s3757_s12 }
 0x1e5   : > { %1074 = vmax.xlane.f32.xlu1 %v1072_v24  ;;  %v1061_v47 = vmul.f32 1.442695, %v2574_v31  ;;  %v1064_v61 = vsub.f32 %v2575_v55, %v4117_v15  ;;  %v1065_v0 = vsub.f32 %v2575_v55, %v4123_v20 }
 0x1e6   : > { %v1059_v36 = vmul.f32 1.442695, %v2573_v26 }
 0x1e8   : > { %3264 = vpow2.f32 %v1059_v36 }
 0x1e9   : > { %1076 = vmax.xlane.f32.xlu1 %v1073_v37  ;;  %3266 = vpow2.f32 %v1061_v47 }
 0x1ed   : > { %1080 = vadd.xlane.f32.xlu1 %v4123_v20 }
 0x1f5   : > { %v3265_v6 = vpop.eup %3264 }
 0x1f6   : > { %v3267_v18 = vpop.eup %3266  ;;  %v1066_v19 = vmul.f32 %v3265_v6, %v1064_v61 }
 0x1f7   : > { %v1067_v23 = vmul.f32 %v3267_v18, %v1065_v0 }
 0x1f8   : > { %1068 = vadd.xlane.f32.xlu0 %v1066_v19 }
 0x1fc   : > { %1070 = vadd.xlane.f32.xlu0 %v1067_v23 }
 0x200   : > { %1078 = vadd.xlane.f32.xlu0 %v4117_v15 }
 0x26e   : > { %v4142_v29 = vpop.xlane.xlu1 %1074 }
 0x272   : > { %v4144_v33 = vpop.xlane.xlu1 %1076 }
 0x276   : > { %v4146_v39 = vpop.xlane.xlu1 %1080 }
 0x281   : > { %v4148_v44 = vpop.xlane.xlu0 %1068 }
 0x285   : > { %v4150_v45 = vpop.xlane.xlu0 %1070  ;;  %1085 = sbr.rel (%p2576_p11) target bundleno = 1074 (0x432), region = 60 }
 0x289   : > { %v4152_v49 = vpop.xlane.xlu0 %1078 }
 0x28a   : > { %v1089_v59 = vld [vmem:[#allocation6 + $0x18] sm:$0xff]  ;;  %v1088_v9 = vld [vmem:[#allocation6 + $0x10] sm:$0xff]  ;;  %v1087_v10 = vld [vmem:[#allocation6 + $0x8] sm:$0xff]  ;;  %3000 = vmatprep.mubr.f32.mxu0 %v3832_v51  ;;  %3011 = vmatprep.mubr.f32.mxu1 %v3795_v35  ;;  %v1620_v24 = vshrl.u32 %v1027_v3, 7  ;;  %v1622_v52 = vstv %s3757_s12  ;;  %vm1618_vm5 = vcmp.lt.s32.totalorder %v4107_v5, 24  ;;  %vm1658_vm7 = vcmask 261120  }
 0x28b   : > { %v4157_v11 = vand.u32 4294901760, %v1089_v59  ;;  %v4159_v4 = vand.u32 4294901760, %v1088_v9  ;;  %v4161_v8 = vand.u32 4294901760, %v1087_v10  ;;  %v1086_v12 = vld [vmem:[#allocation6] sm:$0xff]  ;;  %vm1682_vm15 = vcmask 7168  }
 0x28c   : > { %v4163_v14 = vand.u32 4294901760, %v1086_v12  ;;  %v1621_v37 = vadd.s32 8, %v1620_v24 }
 0x28d   : > { %2992 = vmatprep.subr.mxu0 %v4157_v11  ;;  %v1205_v21 = vsub.f32 %v1089_v59, %v4157_v11  ;;  %v1212_v25 = vsub.f32 %v1088_v9, %v4159_v4  ;;  %v1219_v27 = vsub.f32 %v1087_v10, %v4161_v8 }
 0x28e   : > { %2993 = vmatpush3.xpose.msra.mxu0 %v4157_v11  ;;  %v1226_v38 = vsub.f32 %v1086_v12, %v4163_v14  ;;  %v1624_v18 = vadd.s32 %v1622_v52, %v1621_v37 }
 0x28f   : > { %2994 = vmatprep.subr.mxu0 %v4159_v4  ;;  %v1206_v30 = vand.u32 4294901760, %v1205_v21  ;;  %v1213_v32 = vand.u32 4294901760, %v1212_v25  ;;  %v1220_v34 = vand.u32 4294901760, %v1219_v27 }
 0x290   : > { %v1227_v54 = vand.u32 4294901760, %v1226_v38  ;;  %vm1626_vm6 = vcmp.ne.s32.totalorder %v4107_v5, %v1624_v18 }
 0x291   : > { %v1207_v40 = vsub.f32 %v1205_v21, %v1206_v30  ;;  %v1214_v42 = vsub.f32 %v1212_v25, %v1213_v32  ;;  %v1221_v50 = vsub.f32 %v1219_v27, %v1220_v34  ;;  %vm4215_vm9 = vmand %vm1618_vm5, %vm1626_vm6 }
 0x292   : > { %2995 = vmatpush3.xpose.msra.mxu0 %v4159_v4  ;;  %v1228_v57 = vsub.f32 %v1226_v38, %v1227_v54 }
 0x293   : > { %2996 = vmatprep.subr.mxu0 %v4161_v8  ;;  %v1208_v46 = vand.u32 4294901760, %v1207_v40  ;;  %v1215_v48 = vand.u32 4294901760, %v1214_v42  ;;  %v1222_v56 = vand.u32 4294901760, %v1221_v50  ;;  %v3500_v50 = vmov 0.0  }
 0x294   : > { %v1229_v60 = vand.u32 4294901760, %v1228_v57  ;;  %v2583_v57 = vsel %vm4215_vm9, 1.0, %v3500_v50 }
 0x295   : > { %3003 = vmatprep.subr.mxu1 %v1208_v46 }
 0x296   : > { %2997 = vmatpush3.xpose.msra.mxu0 %v4161_v8  ;;  %3004 = vmatpush3.xpose.msra.mxu1 %v1208_v46 }
 0x297   : > { %2998 = vmatprep.subr.mxu0 %v4163_v14  ;;  %3005 = vmatprep.subr.mxu1 %v1215_v48 }
 0x29a   : > { %2999 = vmatpush3.xpose.msra.mxu0 %v4163_v14  ;;  %3006 = vmatpush3.xpose.msra.mxu1 %v1215_v48 }
 0x29b   : > { %3007 = vmatprep.subr.mxu1 %v1222_v56  ;;  %3014 = vmatprep.subr.mxu0 %v1205_v21 }
 0x29d   : > { %3001 = vmatmul.mubr.f32.vlgmr.msra.gmra.mxu0 %v3954_v58 }
 0x29e   : > { %3008 = vmatpush3.xpose.msra.mxu1 %v1222_v56  ;;  %3015 = vmatpush3.xpose.msra.mxu0 %v1205_v21 }
 0x29f   : > { %3009 = vmatprep.subr.mxu1 %v1229_v60  ;;  %3016 = vmatprep.subr.mxu0 %v1212_v25 }
 0x2a0   : > { %3022 = vmatprep.mubr.f32.mxu0 %v3808_v41 }
 0x2a2   : > { %3010 = vmatpush3.xpose.msra.mxu1 %v1229_v60  ;;  %3017 = vmatpush3.xpose.msra.mxu0 %v1212_v25 }
 0x2a3   : > { %3018 = vmatprep.subr.mxu0 %v1219_v27  ;;  %3025 = vmatprep.subr.mxu1 %v4157_v11 }
 0x2a5   : > { %3012 = vmatmul.mubr.f32.vlgmr.msra.gmra.mxu1 %v3911_v53 }
 0x2a6   : > { %3019 = vmatpush3.xpose.msra.mxu0 %v1219_v27  ;;  %3026 = vmatpush3.xpose.msra.mxu1 %v4157_v11 }
 0x2a7   : > { %3020 = vmatprep.subr.mxu0 %v1226_v38  ;;  %3027 = vmatprep.subr.mxu1 %v4159_v4 }
 0x2a8   : > { %3033 = vmatprep.mubr.f32.mxu1 %v3815_v43 }
 0x2aa   : > { %3021 = vmatpush3.xpose.msra.mxu0 %v1226_v38  ;;  %3028 = vmatpush3.xpose.msra.mxu1 %v4159_v4 }
 0x2ab   : > { %3029 = vmatprep.subr.mxu1 %v4161_v8  ;;  %3036 = vmatprep.subr.mxu0 %v1206_v30 }
 0x2ad   : > { %3023 = vmatmul.mubr.f32.vlgmr.msra.gmra.mxu0 %v3926_v1 }
 0x2ae   : > { %3030 = vmatpush3.xpose.msra.mxu1 %v4161_v8  ;;  %3037 = vmatpush3.xpose.msra.mxu0 %v1206_v30 }
 0x2af   : > { %3031 = vmatprep.subr.mxu1 %v4163_v14  ;;  %3038 = vmatprep.subr.mxu0 %v1213_v32 }
 0x2b0   : > { %3044 = vmatprep.mubr.f32.mxu0 %v3795_v35 }
 0x2b2   : > { %3032 = vmatpush3.xpose.msra.mxu1 %v4163_v14  ;;  %3039 = vmatpush3.xpose.msra.mxu0 %v1213_v32  ;;  %v1623_v32 = vadd.s32 %v1622_v52, %v1620_v24 }
 0x2b3   : > { %3040 = vmatprep.subr.mxu0 %v1220_v34  ;;  %3047 = vmatprep.subr.mxu1 %v4157_v11 }
 0x2b4   : > { %vm1625_vm11 = vcmp.ne.s32.totalorder %v4107_v5, %v1623_v32 }
 0x2b5   : > { %3034 = vmatmul.mubr.f32.vlgmr.msra.gmra.mxu1 %v3939_v28  ;;  %vm1629_vm12 = vmand %vm1618_vm5, %vm1625_vm11 }
 0x2b6   : > { %3041 = vmatpush3.xpose.msra.mxu0 %v1220_v34  ;;  %3048 = vmatpush3.xpose.msra.mxu1 %v4157_v11  ;;  %v2577_v11 = vld [vmem:[%s4470_s14] ss:$0 sm:$0xff] }
 0x2b7   : > { %3042 = vmatprep.subr.mxu0 %v1227_v54  ;;  %3049 = vmatprep.subr.mxu1 %v4159_v4  ;;  %vm1637_vm8 = vcmp.eq.s32.totalorder %v4119_v17, %v2577_v11  ;;  %vm1636_vm13 = vcmp.eq.s32.totalorder %v4113_v13, %v2577_v11 }
 0x2b8   : > { %3055 = vmatprep.mubr.f32.mxu1 %v3795_v35  ;;  %vm1639_vm10 = vmand %vm1637_vm8, %vm4215_vm9 }
 0x2b9   : > { %vm1638_vm14 = vmand %vm1636_vm13, %vm1629_vm12 }
 0x2ba   : > { %3043 = vmatpush3.xpose.msra.mxu0 %v1227_v54  ;;  %3050 = vmatpush3.xpose.msra.mxu1 %v4159_v4  ;;  %v2579_v54 = vsel %vm1639_vm10, 1.0, %v3500_v50  ;;  %v2578_v60 = vsel %vm1638_vm14, 1.0, %v3500_v50 }
 0x2bb   : > { %3051 = vmatprep.subr.mxu1 %v4161_v8  ;;  %v1676_v56 = vsel %vm1658_vm7, %v2579_v54, 0.0 }
 0x2bd   : > { %3045 = vmatmul.mubr.f32.vlgmr.msra.gmra.mxu0 %v3911_v53 }
 0x2be   : > { %3052 = vmatpush3.xpose.msra.mxu1 %v4161_v8 }
 0x2bf   : > { %3053 = vmatprep.subr.mxu1 %v4163_v14 }
 0x2c2   : > { %3054 = vmatpush3.xpose.msra.mxu1 %v4163_v14 }
 0x2c5   : > { %3056 = vmatmul.mubr.f32.vlgmr.msra.gmra.mxu1 %v3911_v53 }
 0x35d   : > { %v3002_v62 = vpop.f32.mrf.mxu0 }
 0x35f   : > { %v1165_v63 = vpop.f32.mrf.mxu0 }
 0x365   : > { %v3013_v2 = vpop.f32.mrf.mxu1 }
 0x366   : > { %v1273_v47 = vadd.f32 %v3013_v2, %v3002_v62  ;;  %v2582_v62 = vsel %vm1629_vm12, 1.0, %v3500_v50 }
 0x367   : > { %v1266_v26 = vpop.f32.mrf.mxu1  ;;  %v1654_v2 = vsub.f32 %v2582_v62, %v2578_v60 }
 0x368   : > { %v1267_v61 = vadd.f32 %v1266_v26, %v1165_v63  ;;  %v1655_v63 = vsub.f32 %v2583_v57, %v2579_v54 }
 0x36d   : > { %v3024_v16 = vpop.f32.mrf.mxu0 }
 0x36e   : > { %v1360_v0 = vadd.f32 %v3024_v16, %v1273_v47  ;;  %v1673_v47 = vsel %vm1658_vm7, %v2578_v60, 0.0 }
 0x36f   : > { %v1352_v31 = vpop.f32.mrf.mxu0 }
 0x370   : > { %v1353_v19 = vadd.f32 %v1352_v31, %v1267_v61 }
 0x375   : > { %v3035_v36 = vpop.f32.mrf.mxu1 }
 0x376   : > { %v1445_v23 = vadd.f32 %v3035_v36, %v1360_v0 }
 0x377   : > { %v1436_v6 = vpop.f32.mrf.mxu1 }
 0x378   : > { %v1437_v9 = vadd.f32 %v1436_v6, %v1353_v19 }
 0x37d   : > { %v3046_v55 = vpop.f32.mrf.mxu0 }
 0x37e   : > { %v1534_v10 = vadd.f32 %v3046_v55, %v1445_v23 }
 0x37f   : > { %v1527_v59 = vpop.f32.mrf.mxu0 }
 0x380   : > { %v1528_v8 = vadd.f32 %v1527_v59, %v1437_v9 }
 0x385   : > { %v3057_v4 = vpop.f32.mrf.mxu1 }
 0x386   : > { %v1615_v12 = vadd.f32 %v3057_v4, %v1534_v10 }
 0x387   : > { %v1608_v14 = vpop.f32.mrf.mxu1 }
 0x388   : > { %v2581_v21 = vadd.f32 -20.0, %v1615_v12  ;;  %v1609_v25 = vadd.f32 %v1608_v14, %v1528_v8  ;;  %v1666_v27 = vsel %vm1618_vm5, %v1615_v12, -1e+30 }
 0x389   : > { %v1670_v34 = vsel %vm1658_vm7, %v1666_v27, -inf }
 0x38a   : > { %v1648_v38 = vmul.f32 1.442695, %v2581_v21  ;;  %v2580_v40 = vadd.f32 -20.0, %v1609_v25  ;;  %1671 = vmax.xlane.f32.xlu1 %v1670_v34  ;;  %v1665_v42 = vsel %vm1618_vm5, %v1609_v25, -1e+30 }
 0x38b   : > { %v1667_v48 = vsel %vm1658_vm7, %v1665_v42, -inf }
 0x38c   : > { %3268 = vpow2.f32 %v1648_v38  ;;  %v1646_v46 = vmul.f32 1.442695, %v2580_v40 }
 0x38e   : > { %3270 = vpow2.f32 %v1646_v46  ;;  %1668 = vmax.xlane.f32.xlu1 %v1667_v48 }
 0x392   : > { %1677 = vadd.xlane.f32.xlu1 %v1676_v56 }
 0x399   : > { %v3269_v16 = vpop.eup %3268 }
 0x39a   : > { %v1657_v24 = vmul.f32 %v3269_v16, %v1655_v63 }
 0x39b   : > { %v3271_v26 = vpop.eup %3270 }
 0x39c   : > { %v1662_v31 = vsel %vm1658_vm7, %v1657_v24, 0.0  ;;  %v1656_v36 = vmul.f32 %v3271_v26, %v1654_v2 }
 0x39d   : > { %1663 = vadd.xlane.f32.xlu0 %v1662_v31 }
 0x39e   : > { %v1659_v37 = vsel %vm1658_vm7, %v1656_v36, 0.0 }
 0x3a1   : > { %1660 = vadd.xlane.f32.xlu0 %v1659_v37 }
 0x3a5   : > { %1674 = vadd.xlane.f32.xlu0 %v1673_v47 }
 0x413   : > { %v1672_v52 = vpop.xlane.xlu1 %1671 }
 0x414   : > { %v1680_v55 = vmax.f32 %v4144_v33, %v1672_v52 }
 0x416   : > { %1684 = vst.msk [vmem:[%s1681_s17 + $0x8] sm:$0xff] %vm1682_vm15, %v1680_v55 }
 0x417   : > { %v1669_v61 = vpop.xlane.xlu1 %1668 }
 0x418   : > { %v1679_v0 = vmax.f32 %v4142_v29, %v1669_v61 }
 0x41a   : > { %1683 = vst.msk [vmem:[%s1681_s17] sm:$0xff] %vm1682_vm15, %v1679_v0 }
 0x41b   : > { %v1678_v6 = vpop.xlane.xlu1 %1677 }
 0x41c   : > { %v1691_v18 = vadd.f32 %v1678_v6, %v4146_v39 }
 0x41e   : > { %1694 = vst.msk [vmem:[%s1692_s19 + $0x8] sm:$0xff] %vm1682_vm15, %v1691_v18 }
 0x426   : > { %v1664_v19 = vpop.xlane.xlu0 %1663 }
 0x427   : > { %v1686_v23 = vadd.f32 %v1664_v19, %v4150_v45 }
 0x429   : > { %1689 = vst.msk [vmem:[%s1687_s24 + $0x8] sm:$0xff] %vm1682_vm15, %v1686_v23 }
 0x42a   : > { %v1661_v59 = vpop.xlane.xlu0 %1660 }
 0x42b   : > { %v1685_v9 = vadd.f32 %v1661_v59, %v4148_v44 }
 0x42d   : > { %1688 = vst.msk [vmem:[%s1687_s24] sm:$0xff] %vm1682_vm15, %v1685_v9 }
 0x42e   : > { %v1675_v10 = vpop.xlane.xlu0 %1674 }
 0x42f   : > { %v1690_v11 = vadd.f32 %v1675_v10, %v4152_v49 }
 0x431   : > { %1693 = vst.msk [vmem:[%s1692_s19] sm:$0xff] %vm1682_vm15, %v1690_v11 }
 0x432 PF: > { %p2584_p2 = scmp.eq.s32.totalorder %s3471_s28, 0 }
 0x433   : > { %s1699_s21 = scalar_lea.vmem (!%p2584_p2), [#allocation2], %s3757_s12  ;;  %s1707_s18 = scalar_lea.vmem (!%p2584_p2), [#allocation3], %s3757_s12 }
 0x434   : > { %1698 = sbr.rel (%p2584_p2) target bundleno = 1087 (0x43f), region = 64  ;;  %s1714_s30 = scalar_lea.vmem (!%p2584_p2), [#allocation4], %s3757_s12 }
 0x439   : > { %v1700_v4 = vld [vmem:[%s1699_s21] sm:$0xff]  ;;  %vm1704_vm0 = vcmask 7168   ;;  %v1701_v8 = vld [vmem:[%s1699_s21 + $0x8] sm:$0xff] }
 0x43a   : > { %v1708_v12 = vld [vmem:[%s1707_s18] sm:$0xff]  ;;  %v1702_v14 = vmax.f32 %v1700_v4, %v4142_v29  ;;  %v1703_v21 = vmax.f32 %v1701_v8, %v4144_v33  ;;  %v1709_v27 = vld [vmem:[%s1707_s18 + $0x8] sm:$0xff] }
 0x43b   : > { %v1710_v25 = vadd.f32 %v1708_v12, %v4148_v44  ;;  %v1715_v30 = vld [vmem:[%s1714_s30] sm:$0xff]  ;;  %v1716_v32 = vld [vmem:[%s1714_s30 + $0x8] sm:$0xff]  ;;  %v1711_v34 = vadd.f32 %v1709_v27, %v4150_v45 }
 0x43c   : > { %v1717_v38 = vadd.f32 %v1715_v30, %v4152_v49  ;;  %v1718_v40 = vadd.f32 %v1716_v32, %v4146_v39  ;;  %1705 = vst.msk [vmem:[%s1699_s21] sm:$0xff] %vm1704_vm0, %v1702_v14  ;;  %1706 = vst.msk [vmem:[%s1699_s21 + $0x8] sm:$0xff] %vm1704_vm0, %v1703_v21 }
 0x43d   : > { %1712 = vst.msk [vmem:[%s1707_s18] sm:$0xff] %vm1704_vm0, %v1710_v25  ;;  %1713 = vst.msk [vmem:[%s1707_s18 + $0x8] sm:$0xff] %vm1704_vm0, %v1711_v34 }
 0x43e   : > { %1719 = vst.msk [vmem:[%s1714_s30] sm:$0xff] %vm1704_vm0, %v1717_v38  ;;  %1720 = vst.msk [vmem:[%s1714_s30 + $0x8] sm:$0xff] %vm1704_vm0, %v1718_v40 }
 0x43f PF: > { %s4473_s6 = sld [smem:[#allocation16_spill]] }
 0x445   : > { %p2585_p5 = scmp.ne.s32.totalorder %s4473_s6, 1 }
 0x446   : > { %s1725_s29 = scalar_lea.vmem (!%p2585_p5), [#allocation2], %s3757_s12  ;;  %s1728_s15 = scalar_lea.vmem (!%p2585_p5), [#allocation3], %s3757_s12 }
 0x447   : > { %1724 = sbr.rel (%p2585_p5) target bundleno = 2087 (0x827), region = 68  ;;  %p2590_p6 = scmp.ne.s32.totalorder (!%p2585_p5), %s3471_s28, 0 }
 0x44c   : > { %v3501_v29 = vmov 0   ;;  %v1726_v33 = vld [vmem:[%s1725_s29] sm:$0xff]  ;;  %v1727_v39 = vld [vmem:[%s1725_s29 + $0x8] sm:$0xff]  ;;  %v2588_v63 = vadd.f32 -20.0, %v4127_v22  ;;  %v2589_v16 = vadd.f32 -20.0, %v4125_v7  ;;  %s4474_s13 = sld [smem:[#allocation25_spill]] (!%p2590_p6) }
 0x44d   : > { %3272 = vset.pattern.permute.xlu0 %v3501_v29  ;;  %v2586_v44 = vadd.f32 -20.0, %v1726_v33  ;;  %v2587_v45 = vadd.f32 -20.0, %v1727_v39  ;;  %v1729_v48 = vld [vmem:[%s1728_s15] sm:$0xff]  ;;  %v1730_v56 = vld [vmem:[%s1728_s15 + $0x8] sm:$0xff]  ;;  %s2356_s14 = scalar_lea.vmem (!%p2590_p6), [#allocation5], %s3757_s12 }
 0x44e   : > { %v1743_v2 = vmul.f32 1.442695, %v2588_v63  ;;  %v1745_v24 = vmul.f32 1.442695, %v2589_v16 }
 0x44f   : > { %v1733_v49 = vmul.f32 1.442695, %v2586_v44  ;;  %v1735_v42 = vmul.f32 1.442695, %v2587_v45 }
 0x451   : > { %3273 = vpow2.f32 %v1733_v49 }
 0x452   : > { %3275 = vpow2.f32 %v1735_v42 }
 0x453   : > { %3277 = vpow2.f32 %v1743_v2 }
 0x454   : > { %3279 = vpow2.f32 %v1745_v24 }
 0x45e   : > { %v3274_v46 = vpop.eup %3273 }
 0x45f   : > { %v3276_v50 = vpop.eup %3275  ;;  %v1737_v54 = vmul.f32 1e-06, %v3274_v46 }
 0x460   : > { %v1738_v57 = vmul.f32 1e-06, %v3276_v50  ;;  %v3278_v26 = vpop.eup %3277 }
 0x461   : > { %v1739_v60 = vadd.f32 %v1737_v54, %v1729_v48  ;;  %v3280_v37 = vpop.eup %3279 }
 0x462   : > { %v1740_v62 = vadd.f32 %v1738_v57, %v1730_v56 }
 0x463   : > { %1749 = vperm.xlu0 %3272, %v1739_v60  }
 0x467   : > { %1754 = vperm.xlu0 %3272, %v1740_v62  }
 0x4de   : > { %v4271_v31 = vpop.permute.xlu0 %1749 }
 0x4df   : > { %v1757_v36 = vadd.f32 %v3278_v26, %v4271_v31 }
 0x4e1   : > { %3281 = vlog2.f32 %v1757_v36 }
 0x4e2   : > { %v4274_v47 = vpop.permute.xlu0 %1754 }
 0x4e3   : > { %v1758_v52 = vadd.f32 %v3280_v37, %v4274_v47 }
 0x4e5   : > { %3283 = vlog2.f32 %v1758_v52 }
 0x4ee   : > { %v3282_v55 = vpop.eup %3281 }
 0x4ef   : > { %v1760_v22 = vmul.f32 0.6931472, %v3282_v55 }
 0x4f1   : > { %v1763_v61 = vsub.f32 %v2588_v63, %v1760_v22 }
 0x4f2   : > { %v3284_v0 = vpop.eup %3283 }
 0x4f3   : > { %v1765_v7 = vmul.f32 %v4117_v15, %v1763_v61  ;;  %v1762_v6 = vmul.f32 0.6931472, %v3284_v0 }
 0x4f5   : > { %1767 = vadd.xlane.f32.xlu1 %v1765_v7  ;;  %v1764_v18 = vsub.f32 %v2589_v16, %v1762_v6 }
 0x4f7   : > { %v1766_v19 = vmul.f32 %v4123_v20, %v1764_v18 }
 0x4f9   : > { %1769 = vadd.xlane.f32.xlu1 %v1766_v19 }
 0x57e   : > { %v4279_v23 = vpop.xlane.xlu1 %1767  ;;  %1774 = sbr.rel (%p2590_p6) target bundleno = 1851 (0x73b), region = 72 }
 0x582   : > { %v4281_v59 = vpop.xlane.xlu1 %1769 }
 0x583   : > { %v1778_v9 = vld [vmem:[#allocation6 + $0x18] sm:$0xff]  ;;  %v1777_v10 = vld [vmem:[#allocation6 + $0x10] sm:$0xff]  ;;  %v1776_v11 = vld [vmem:[#allocation6 + $0x8] sm:$0xff]  ;;  %3066 = vmatprep.mubr.f32.mxu0 %v3832_v51  ;;  %3077 = vmatprep.mubr.f32.mxu1 %v3795_v35  ;;  %v2309_v7 = vshrl.u32 %v1027_v3, 7  ;;  %vm2307_vm2 = vcmp.lt.s32.totalorder %v4107_v5, 24  ;;  %vm2349_vm10 = vcmask 261120  }
 0x584   : > { %v4286_v15 = vand.u32 4294901760, %v1778_v9  ;;  %v4288_v4 = vand.u32 4294901760, %v1777_v10  ;;  %v4290_v20 = vand.u32 4294901760, %v1776_v11  ;;  %v1775_v8 = vld [vmem:[#allocation6] sm:$0xff]  ;;  %vm2357_vm11 = vcmask 7168  }
 0x585   : > { %v4292_v12 = vand.u32 4294901760, %v1775_v8  ;;  %v2310_v19 = vadd.s32 8, %v2309_v7 }
 0x586   : > { %3058 = vmatprep.subr.mxu0 %v4286_v15  ;;  %v1894_v14 = vsub.f32 %v1778_v9, %v4286_v15  ;;  %v1901_v21 = vsub.f32 %v1777_v10, %v4288_v4  ;;  %v1908_v25 = vsub.f32 %v1776_v11, %v4290_v20  ;;  %v2311_v9 = vstv %s3757_s12 }
 0x587   : > { %3059 = vmatpush3.xpose.msra.mxu0 %v4286_v15  ;;  %v1915_v32 = vsub.f32 %v1775_v8, %v4292_v12  ;;  %v2312_v10 = vadd.s32 %v2311_v9, %v2309_v7  ;;  %v2313_v11 = vadd.s32 %v2311_v9, %v2310_v19  ;;  %v3502_v8 = vmov 0.0  }
 0x588   : > { %3060 = vmatprep.subr.mxu0 %v4288_v4  ;;  %v1895_v51 = vand.u32 4294901760, %v1894_v14  ;;  %v1902_v27 = vand.u32 4294901760, %v1901_v21  ;;  %v1909_v30 = vand.u32 4294901760, %v1908_v25 }
 0x589   : > { %v1916_v39 = vand.u32 4294901760, %v1915_v32  ;;  %vm2314_vm1 = vcmp.ne.s32.totalorder %v4107_v5, %v2312_v10  ;;  %vm2315_vm3 = vcmp.ne.s32.totalorder %v4107_v5, %v2313_v11 }
 0x58a   : > { %v1896_v34 = vsub.f32 %v1894_v14, %v1895_v51  ;;  %v1903_v38 = vsub.f32 %v1901_v21, %v1902_v27  ;;  %v1910_v33 = vsub.f32 %v1908_v25, %v1909_v30  ;;  %vm2318_vm4 = vmand %vm2307_vm2, %vm2314_vm1 }
 0x58b   : > { %3061 = vmatpush3.xpose.msra.mxu0 %v4288_v4  ;;  %v1917_v45 = vsub.f32 %v1915_v32, %v1916_v39  ;;  %vm2319_vm6 = vmand %vm2307_vm2, %vm2315_vm3 }
 0x58c   : > { %3062 = vmatprep.subr.mxu0 %v4290_v20  ;;  %v1897_v40 = vand.u32 4294901760, %v1896_v34  ;;  %v1904_v29 = vand.u32 4294901760, %v1903_v38  ;;  %v1911_v44 = vand.u32 4294901760, %v1910_v33 }
 0x58d   : > { %v1918_v49 = vand.u32 4294901760, %v1917_v45 }
 0x58e   : > { %3069 = vmatprep.subr.mxu1 %v1897_v40 }
 0x58f   : > { %3063 = vmatpush3.xpose.msra.mxu0 %v4290_v20  ;;  %3070 = vmatpush3.xpose.msra.mxu1 %v1897_v40 }
 0x590   : > { %3064 = vmatprep.subr.mxu0 %v4292_v12  ;;  %3071 = vmatprep.subr.mxu1 %v1904_v29 }
 0x593   : > { %3065 = vmatpush3.xpose.msra.mxu0 %v4292_v12  ;;  %3072 = vmatpush3.xpose.msra.mxu1 %v1904_v29 }
 0x594   : > { %3073 = vmatprep.subr.mxu1 %v1911_v44  ;;  %3080 = vmatprep.subr.mxu0 %v1894_v14 }
 0x596   : > { %3067 = vmatmul.mubr.f32.vlgmr.msra.gmra.mxu0 %v3954_v58 }
 0x597   : > { %3074 = vmatpush3.xpose.msra.mxu1 %v1911_v44  ;;  %3081 = vmatpush3.xpose.msra.mxu0 %v1894_v14 }
 0x598   : > { %3075 = vmatprep.subr.mxu1 %v1918_v49  ;;  %3082 = vmatprep.subr.mxu0 %v1901_v21 }
 0x599   : > { %3088 = vmatprep.mubr.f32.mxu0 %v3808_v41 }
 0x59b   : > { %3076 = vmatpush3.xpose.msra.mxu1 %v1918_v49  ;;  %3083 = vmatpush3.xpose.msra.mxu0 %v1901_v21 }
 0x59c   : > { %3084 = vmatprep.subr.mxu0 %v1908_v25  ;;  %3091 = vmatprep.subr.mxu1 %v4286_v15 }
 0x59e   : > { %3078 = vmatmul.mubr.f32.vlgmr.msra.gmra.mxu1 %v3911_v53 }
 0x59f   : > { %3085 = vmatpush3.xpose.msra.mxu0 %v1908_v25  ;;  %3092 = vmatpush3.xpose.msra.mxu1 %v4286_v15 }
 0x5a0   : > { %3086 = vmatprep.subr.mxu0 %v1915_v32  ;;  %3093 = vmatprep.subr.mxu1 %v4288_v4 }
 0x5a1   : > { %3099 = vmatprep.mubr.f32.mxu1 %v3815_v43 }
 0x5a3   : > { %3087 = vmatpush3.xpose.msra.mxu0 %v1915_v32  ;;  %3094 = vmatpush3.xpose.msra.mxu1 %v4288_v4 }
 0x5a4   : > { %3095 = vmatprep.subr.mxu1 %v4290_v20  ;;  %3102 = vmatprep.subr.mxu0 %v1895_v51 }
 0x5a6   : > { %3089 = vmatmul.mubr.f32.vlgmr.msra.gmra.mxu0 %v3926_v1 }
 0x5a7   : > { %3096 = vmatpush3.xpose.msra.mxu1 %v4290_v20  ;;  %3103 = vmatpush3.xpose.msra.mxu0 %v1895_v51 }
 0x5a8   : > { %3097 = vmatprep.subr.mxu1 %v4292_v12  ;;  %3104 = vmatprep.subr.mxu0 %v1902_v27 }
 0x5a9   : > { %3110 = vmatprep.mubr.f32.mxu0 %v3795_v35 }
 0x5ab   : > { %3098 = vmatpush3.xpose.msra.mxu1 %v4292_v12  ;;  %3105 = vmatpush3.xpose.msra.mxu0 %v1902_v27 }
 0x5ac   : > { %3106 = vmatprep.subr.mxu0 %v1909_v30  ;;  %3113 = vmatprep.subr.mxu1 %v4286_v15 }
 0x5ae   : > { %3100 = vmatmul.mubr.f32.vlgmr.msra.gmra.mxu1 %v3939_v28 }
 0x5af   : > { %3107 = vmatpush3.xpose.msra.mxu0 %v1909_v30  ;;  %3114 = vmatpush3.xpose.msra.mxu1 %v4286_v15  ;;  %v2591_v15 = vld [vmem:[%s4474_s13] ss:$0 sm:$0xff] }
 0x5b0   : > { %3108 = vmatprep.subr.mxu0 %v1916_v39  ;;  %3115 = vmatprep.subr.mxu1 %v4288_v4  ;;  %vm2325_vm5 = vcmp.eq.s32.totalorder %v4113_v13, %v2591_v15  ;;  %vm2326_vm7 = vcmp.eq.s32.totalorder %v4119_v17, %v2591_v15 }
 0x5b1   : > { %3121 = vmatprep.mubr.f32.mxu1 %v3795_v35  ;;  %vm2327_vm8 = vmand %vm2325_vm5, %vm2318_vm4 }
 0x5b2   : > { %vm2328_vm9 = vmand %vm2326_vm7, %vm2319_vm6 }
 0x5b3   : > { %3109 = vmatpush3.xpose.msra.mxu0 %v1916_v39  ;;  %3116 = vmatpush3.xpose.msra.mxu1 %v4288_v4  ;;  %v2595_v25 = vsel %vm2328_vm9, 1.0, %v3502_v8 }
 0x5b4   : > { %3117 = vmatprep.subr.mxu1 %v4290_v20 }
 0x5b6   : > { %3111 = vmatmul.mubr.f32.vlgmr.msra.gmra.mxu0 %v3911_v53 }
 0x5b7   : > { %3118 = vmatpush3.xpose.msra.mxu1 %v4290_v20 }
 0x5b8   : > { %3119 = vmatprep.subr.mxu1 %v4292_v12 }
 0x5bb   : > { %3120 = vmatpush3.xpose.msra.mxu1 %v4292_v12  ;;  %v2594_v12 = vsel %vm2327_vm8, 1.0, %v3502_v8 }
 0x5be   : > { %3122 = vmatmul.mubr.f32.vlgmr.msra.gmra.mxu1 %v3911_v53 }
 0x656   : > { %v3068_v41 = vpop.f32.mrf.mxu0 }
 0x658   : > { %v1854_v43 = vpop.f32.mrf.mxu0 }
 0x65e   : > { %v3079_v1 = vpop.f32.mrf.mxu1 }
 0x65f   : > { %v1962_v46 = vadd.f32 %v3079_v1, %v3068_v41 }
 0x660   : > { %v1955_v35 = vpop.f32.mrf.mxu1 }
 0x661   : > { %v1956_v50 = vadd.f32 %v1955_v35, %v1854_v43 }
 0x666   : > { %v3090_v28 = vpop.f32.mrf.mxu0 }
 0x667   : > { %v2049_v54 = vadd.f32 %v3090_v28, %v1962_v46 }
 0x668   : > { %v2041_v58 = vpop.f32.mrf.mxu0 }
 0x669   : > { %v2042_v57 = vadd.f32 %v2041_v58, %v1956_v50 }
 0x66e   : > { %v3101_v42 = vpop.f32.mrf.mxu1 }
 0x66f   : > { %v2134_v60 = vadd.f32 %v3101_v42, %v2049_v54 }
 0x670   : > { %v2125_v56 = vpop.f32.mrf.mxu1 }
 0x671   : > { %v2126_v63 = vadd.f32 %v2125_v56, %v2042_v57 }
 0x676   : > { %v3112_v48 = vpop.f32.mrf.mxu0 }
 0x677   : > { %v2223_v2 = vadd.f32 %v3112_v48, %v2134_v60 }
 0x678   : > { %v2216_v62 = vpop.f32.mrf.mxu0 }
 0x679   : > { %v2217_v24 = vadd.f32 %v2216_v62, %v2126_v63 }
 0x67e   : > { %v3123_v16 = vpop.f32.mrf.mxu1 }
 0x67f   : > { %v2304_v53 = vadd.f32 %v3123_v16, %v2223_v2 }
 0x680   : > { %v2297_v26 = vpop.f32.mrf.mxu1 }
 0x681   : > { %v2593_v36 = vadd.f32 -20.0, %v2304_v53  ;;  %v2298_v37 = vadd.f32 %v2297_v26, %v2217_v24 }
 0x683   : > { %v2337_v52 = vmul.f32 1.442695, %v2593_v36  ;;  %v2592_v55 = vadd.f32 -20.0, %v2298_v37 }
 0x685   : > { %3285 = vpow2.f32 %v2337_v52  ;;  %v2335_v22 = vmul.f32 1.442695, %v2592_v55 }
 0x687   : > { %3287 = vpow2.f32 %v2335_v22 }
 0x692   : > { %v3286_v61 = vpop.eup %3285 }
 0x693   : > { %v2340_v0 = vadd.f32 %v3286_v61, %v4274_v47 }
 0x694   : > { %v3288_v6 = vpop.eup %3287 }
 0x695   : > { %3289 = vlog2.f32 %v2340_v0  ;;  %v2339_v18 = vadd.f32 %v3288_v6, %v4271_v31 }
 0x697   : > { %3291 = vlog2.f32 %v2339_v18 }
 0x6a2   : > { %v3290_v47 = vpop.eup %3289 }
 0x6a3   : > { %v2344_v31 = vmul.f32 0.6931472, %v3290_v47 }
 0x6a4   : > { %v3292_v4 = vpop.eup %3291 }
 0x6a5   : > { %v2342_v20 = vmul.f32 0.6931472, %v3292_v4  ;;  %v2346_v14 = vsub.f32 %v2593_v36, %v2344_v31 }
 0x6a7   : > { %v2345_v21 = vsub.f32 %v2592_v55, %v2342_v20  ;;  %v2348_v27 = vmul.f32 %v2595_v25, %v2346_v14 }
 0x6a9   : > { %v2347_v51 = vmul.f32 %v2594_v12, %v2345_v21  ;;  %v2353_v13 = vsel %vm2349_vm10, %v2348_v27, 0.0 }
 0x6ab   : > { %v2350_v5 = vsel %vm2349_vm10, %v2347_v51, 0.0 }
 0x6ac   : > { %2351 = vadd.xlane.f32.xlu0 %v2350_v5 }
 0x6b0   : > { %2354 = vadd.xlane.f32.xlu0 %v2353_v13 }
 0x735   : > { %v2352_v17 = vpop.xlane.xlu0 %2351 }
 0x736   : > { %2358 = vst.msk [vmem:[%s2356_s14] sm:$0xff] %vm2357_vm11, %v2352_v17 }
 0x739   : > { %v2355_v30 = vpop.xlane.xlu0 %2354 }
 0x73a   : > { %2359 = vst.msk [vmem:[%s2356_s14 + $0x8] sm:$0xff] %vm2357_vm11, %v2355_v30 }
 0x73b PF: > { %s2360_s17 = scalar_lea.vmem [#allocation5], %s3757_s12  ;;  %vm2365_vm12 = vcmask 7168   ;;  %p2596_p8 = scmp.ne.s32.totalorder %s3471_s28, 1 }
 0x73c   : > { %s2374_s19 = scalar_lea.vmem (!%p2596_p8), [#allocation4], %s3757_s12 }
 0x740   : > { %2371 = sbr.rel (%p2596_p8) target bundleno = 2087 (0x827), region = 76 }
 0x741   : > { %v2361_v32 = vld [vmem:[%s2360_s17] sm:$0xff]  ;;  %v2362_v34 = vld [vmem:[%s2360_s17 + $0x8] sm:$0xff] }
 0x742   : > { %v2363_v38 = vadd.f32 %v2361_v32, %v4279_v23  ;;  %v2364_v40 = vadd.f32 %v2362_v34, %v4281_v59 }
 0x744   : > { %2366 = vst.msk [vmem:[%s2360_s17] sm:$0xff] %vm2365_vm12, %v2363_v38  ;;  %2367 = vst.msk [vmem:[%s2360_s17 + $0x8] sm:$0xff] %vm2365_vm12, %v2364_v40 }
 0x745   : > { %v2375_v29 = vld [vmem:[%s2374_s19] sm:$0xff]  ;;  %v2376_v33 = vld [vmem:[%s2374_s19 + $0x8] sm:$0xff]  ;;  %v2384_v23 = vshrl.u32 %v1027_v3, 7  ;;  %v2386_v59 = vstv %s3757_s12 }
 0x746   : > { %v2377_v39 = vmax.f32 %v2375_v29, 1.0  ;;  %v2378_v44 = vmax.f32 %v2376_v33, 1.0 }
 0x747   : > { %v2385_v45 = vadd.s32 8, %v2384_v23  ;;  %v2387_v49 = vadd.s32 %v2386_v59, %v2384_v23 }
 0x748   : > { %3293 = vrcp.f32 %v2377_v39 }
 0x749   : > { %3295 = vrcp.f32 %v2378_v44  ;;  %v2388_v41 = vadd.s32 %v2386_v59, %v2385_v45  ;;  %vm2389_vm13 = vcmp.lt.s32.totalorder %v2387_v49, 24 }
 0x74b   : > { %v2372_v43 = vld [vmem:[%s2360_s17] sm:$0xff]  ;;  %v2373_v1 = vld [vmem:[%s2360_s17 + $0x8] sm:$0xff]  ;;  %vm2390_vm14 = vcmp.lt.s32.totalorder %v2388_v41, 24 }
 0x755   : > { %v3294_v28 = vpop.eup %3293 }
 0x756   : > { %v3296_v35 = vpop.eup %3295  ;;  %v2380_v58 = vmul.f32 %v3294_v28, %v2372_v43 }
 0x757   : > { %v2382_v42 = vmul.f32 %v3296_v35, %v2373_v1 }
 0x758   : > { %v2391_v46 = vsel %vm2389_vm13, %v2380_v58, 0.0 }
 0x759   : > { %v2392_v48 = vsel %vm2390_vm14, %v2382_v42, 0.0  ;;  %v2393_v50 = vsel %vm2365_vm12, %v2391_v46, 0.0 }
 0x75a   : > { %v2394_v54 = vsel %vm2365_vm12, %v2392_v48, 0.0 }
 0x75b   : > { %v2395_v3 = vadd.f32 %v2394_v54, %v2393_v50 }
 0x75d   : > { %2396 = vadd.xlane.f32.xlu0 %v2395_v3 }
 0x7e6   : > { %v2397_v56 = vpop.xlane.xlu0 %2396 }
 0x7e7   : > { %v2398_v57 = vrot.slane %v2397_v56, 4 }
 0x7e9   : > { %v2399_v60 = vadd.f32 %v2398_v57, %v2397_v56 }
 0x7eb   : > { %v2400_v62 = vrot.slane %v2399_v60, 2 }
 0x7ed   : > { %v2401_v63 = vadd.f32 %v2400_v62, %v2399_v60 }
 0x7ef   : > { %v2402_v2 = vrot.slane %v2401_v63, 1 }
 0x7f1   : > { %v2403_v16 = vadd.f32 %v2402_v2, %v2401_v63 }
 0x7f3   : > { %3124 = vpush %v2403_v16 }
 0x824   : > { %s3125_s28 = spop %3124 }
 0x825   : > { %v2405_v24 = vstv %s3125_s28 }
 0x826   : > { %2406 = vst [vmem:[%s314_s16] sm:$0xff] %v2405_v24 }
 0x827 PF: > { %s4475_s12 = sld [smem:[#allocation19_spill]]  ;;  %s2598_s24 = sshll.u32 %s3467_s27, 7 }
 0x828   : > { %s4476_s30 = sld [smem:[#allocation26_spill]]  ;;  %s2421_s15 = sshll.u32 %s314_s16, 4  ;;  %s2422_s15 = int_to_ptr.vmem [resolvable:$true] %s2421_s15 }
 0x829   : > { %s2408_s20 = scalar_lea.sflag [#allocation8], %s312_s4  ;;  %s3351_s11 = scalar_lea.vmem %s2422_s15, 128 }
 0x82a   : > { %p3352_p7 = scmp.ne.s32.totalorder %s2422_s15, %s3351_s11  ;;  %s3503_s13 = smov [#allocation11]  }
 0x82b   : > { %s3355_s14 = sshll.u32 %s3503_s13, 4  ;;  %s3356_s14 = int_to_ptr.vmem [resolvable:$false] %s3355_s14 }
 0x82c   : > { %s3357_s17 = scalar_lea.vmem %s3356_s14, 256  ;;  %p3358_p0 = scmp.lt.s32.totalorder %s2422_s15, %s3356_s14 }
 0x82d   : > { %p4478_p9 = scmp.ne.s32.totalorder %s4475_s12, 0  ;;  %p3359_p4 = scmp.lt.s32.totalorder %s3357_s17, %s3351_s11 }
 0x82e   : > { %s4477_s6 = smov %s4476_s30  ;;  %s2419_s29 = scalar_lea.hbm %s4476_s30, %s2598_s24 }
 0x82f   : > { %p3353_p10 = pnand %p3352_p7, %p4478_p9  ;;  %p3360_p13 = por %p3359_p4, %p3358_p0 }
 0x831   : > { %p3354_p12 = pneg %p3353_p10 }
 0x833   : > { %p3361_p1 = pnand %p3360_p13, %p3354_p12 }
 0x835   : > { %3364 = shalt.err (!%p3361_p1)
}
 0x836   : > { %s3365_s27 = scalar_lea.hbm %s2419_s29, 128  ;;  %s3369_s16 = scalar_lea.hbm %s4477_s6, 256 }
 0x837   : > { %p3366_p3 = scmp.ne.s32.totalorder %s2419_s29, %s3365_s27  ;;  %p3370_p5 = scmp.lt.s32.totalorder %s2419_s29, %s4477_s6 }
 0x838   : > { %p3371_p6 = scmp.lt.s32.totalorder %s3369_s16, %s3365_s27 }
 0x839   : > { %p3367_p11 = pnand %p3366_p3, %p4478_p9 }
 0x83a   : > { %p3372_p8 = por %p3371_p6, %p3370_p5 }
 0x83b   : > { %p3368_p2 = pneg %p3367_p11 }
 0x83d   : > { %p3373_p7 = pnand %p3372_p8, %p3368_p2 }
 0x83f   : > { %3376 = shalt.err (!%p3373_p7)
}
 0x840   : > { %3132 = dma.vmem_to_hbm [thread:$0]  (%p4478_p9), %s2422_s15, 128, %s2419_s29, %s2408_s20  }
 0x841 PF: > { %s4479_s24 = sld [smem:[#allocation15_spill]]  ;;  %p3149_p10 = scmp.ge.s32.totalorder %s3491_s9, 2 }
 0x842   : > { %s4480_s21 = sld [smem:[#allocation20_spill]] }
 0x847   : > { %s2433_s18 = sand.u32 1, %s4479_s24  }
 0x848   : > { %p4481_p12 = scmp.ne.s32.totalorder %s4480_s21, 0  ;;  %s2434_s30 = scalar_lea.sflag [#allocation8], %s2433_s18 }
 0x84a   : > { %p3143_p0 = pnand %p3149_p10, %p4481_p12 }
 0x84c   : > { %p3144_p4 = pneg %p3143_p0 }
 0x84e   : > { %3438 = dma.done.wait (%p3144_p4), %s2434_s30, 128  }
 0x84f   : > { %3440 = vsyncadd (%p3144_p4), %s2434_s30, 4294967168  ;;  %s23_s9 = sadd.s32 1, %s3491_s9   ;;  %s4483_s27 = sld [smem:[#allocation17_spill]] }
 0x850   : > { %p4383_p13 = scmp.ge.s32.totalorder %s23_s9, 10   ;;  %s4484_s29 = sld [smem:[#allocation18_spill]] }
 0x851   : > { %s4485_s30 = sld [smem:[#allocation21_spill]]  ;;  %s4488_s21 = smov %s3447_s22 }
 0x852   : > { %s4486_s12 = sld [smem:[#allocation22_spill]]  ;;  %s4489_s22 = smov %s3451_s23 }
 0x853   : > { %s4487_s8 = sld [smem:[#allocation23_spill]]  ;;  %s4490_s23 = smov %s3669_s10 }
 0x854   : > { %s4491_s24 = smov %s3459_s25  ;;  %s4492_s25 = smov %s3463_s26 }
 0x855   : > { %s4493_s26 = smov %s3674_s1  ;;  %s4494_s28 = smov %s3483_s7 }
 0x856   :  { %22 = sbr.rel (!%p4383_p13) target bundleno = 15 (0xf), region = 134 }
 0x858   : > { %s4495_s7 = smov %s4486_s12 }
 0x85b   :  { %2439 = vsyncpa [#allocation7], 1 }
 0x85c   :  { %2441 = vsyncpa [#allocation7 + $0x1], 1 }
 0x85d   :  { %2442 = vsyncpa [#allocation10], 1 }
 0x85e   :  { %2444 = vsyncpa [#allocation10 + $0x1], 1 }
 0x85f   :  { %2445 = vsyncpa [#allocation8], 1 }
 0x860   :  { %2447 = vsyncpa [#allocation8 + $0x1], 1 }

</bundles_post_ra>
